<compile_context>
chip_gen: v5e
topology: v5e:2x2
jax: 0.10.0
libtpu: 0.0.40
codegen_flags: <defaults>
</compile_context>

<pallas_src>
import numpy as np
import jax
import jax.numpy as jnp
from jax import lax
from jax.experimental import pallas as pl
from jax.experimental.pallas import tpu as pltpu

# Scaled-down STFT config (module defaults are 2048/275/1100; same algorithm).
FILTER_LENGTH = 256   # n_fft
HOP_LENGTH = 64
WIN_LENGTH = 192
T_BLOCK_MAX = 128     # frames per grid step (MXU-sized)
LANE = 128


def _round_up(x, m):
    return ((x + m - 1) // m) * m


# ----------------------------- init-time glue ------------------------------

def _hann_periodic(win_length):
    n = np.arange(win_length)
    return 0.5 - 0.5 * np.cos(2.0 * np.pi * n / win_length)


def _padded_window(n_fft, win_length):
    w = _hann_periodic(win_length)
    lpad = (n_fft - win_length) // 2
    out = np.zeros(n_fft, dtype=np.float64)
    out[lpad:lpad + win_length] = w
    return out


def _dft_bases(n_fft, win_length):
    """Forward/inverse one-sided real-DFT bases (analysis/synthesis windows
    folded in), both unfused (reference / bias derivation) and fused +
    lane-padded (Pallas kernel)."""
    window = _padded_window(n_fft, win_length)
    n_freq = n_fft // 2 + 1
    n = np.arange(n_fft)[:, None]                         # [N, 1]
    k = np.arange(n_freq)[None, :]                        # [1, F]
    ang = 2.0 * np.pi * n * k / n_fft                     # [N, F]
    cosb = (window[:, None] * np.cos(ang)).astype(np.float32)     # [N, F]
    sinb = (-window[:, None] * np.sin(ang)).astype(np.float32)    # [N, F]

    # irfft-equivalent Hermitian inverse basis; Im at DC/Nyquist ignored.
    c_re = np.full(n_freq, 2.0); c_re[0] = 1.0; c_re[-1] = 1.0
    c_im = np.full(n_freq, 2.0); c_im[0] = 0.0; c_im[-1] = 0.0
    ang_i = 2.0 * np.pi * np.arange(n_freq)[:, None] * np.arange(n_fft)[None, :] / n_fft
    icosb = (c_re[:, None] * np.cos(ang_i) / n_fft * window[None, :]).astype(np.float32)   # [F, N]
    isinb = (-c_im[:, None] * np.sin(ang_i) / n_fft * window[None, :]).astype(np.float32)  # [F, N]

    # Fused + zero-padded (F -> Fp, multiple of 128) bases: the forward matmul
    # produces [re | im] in one shot, the inverse matmul consumes [re_d | im_d].
    f_pad = _round_up(n_freq, LANE)
    fwd = np.zeros((n_fft, 2 * f_pad), np.float32)
    fwd[:, :n_freq] = cosb
    fwd[:, f_pad:f_pad + n_freq] = sinb
    inv = np.zeros((2 * f_pad, n_fft), np.float32)
    inv[:n_freq, :] = icosb
    inv[f_pad:f_pad + n_freq, :] = isinb
    # TODO(synk): for the production 2048-point config, cast fwd/inv to bf16
    # (keep f32 accumulation) and single-buffer them (pl.Buffered(1)) or DMA
    # them once into scratch so ~33 MB of bases fits v7x's 64 MiB VMEM.
    return (cosb, sinb, icosb, isinb, fwd, inv,
            window.astype(np.float32), n_freq, f_pad)


def _frame(y_1d, n_fft, hop):
    """librosa.stft framing: center pad n_fft//2 with zeros, hop-strided windows."""
    # TODO(synk): framing could be folded into the kernel (slice overlapping
    # windows out of a VMEM-resident audio block) to cut the ~n_fft/hop x
    # redundant HBM copy; kept as glue here for lowering robustness.
    y_pad = jnp.pad(y_1d, (n_fft // 2, n_fft // 2))
    n_frames = 1 + (y_pad.shape[0] - n_fft) // hop
    idx = jnp.arange(n_frames)[:, None] * hop + jnp.arange(n_fft)[None, :]
    return y_pad[idx], n_frames


# ------------------------------ Pallas kernel -------------------------------

def _denoiser_kernel(strength_ref, frames_ref, fwd_ref, inv_ref, bias_ref, out_ref):
    # frames_ref: [tT, N]   fwd_ref: [N, 2*Fp]   inv_ref: [2*Fp, N]   bias: [1, Fp]
    f_pad = bias_ref.shape[-1]
    frames = frames_ref[...]

    # Fused forward real-DFT: one MXU matmul -> [re | im].
    spec = jnp.dot(frames, fwd_ref[...], preferred_element_type=jnp.float32)   # [tT, 2*Fp]
    re = spec[:, :f_pad]
    im = spec[:, f_pad:]

    # magnitude/phase with a single rsqrt (EUP) instead of sqrt + 2 divides.
    p = re * re + im * im
    nz = p > 0.0
    inv_mag = jnp.where(nz, lax.rsqrt(jnp.where(nz, p, 1.0)), 0.0)
    mag = p * inv_mag
    # librosa.magphase: phase = exp(1j*angle(D)); angle(0) = 0 -> phase = 1+0j
    ph_re = jnp.where(nz, re * inv_mag, 1.0)
    ph_im = im * inv_mag

    mag_d = mag - bias_ref[...] * strength_ref[0]     # no clamp (matches module)
    re_d = mag_d * ph_re
    im_d = mag_d * ph_im

    # Fused inverse real-DFT (synthesis window folded in): one MXU matmul.
    spec_d = jnp.concatenate([re_d, im_d], axis=1)                              # [tT, 2*Fp]
    out_ref[...] = jnp.dot(spec_d, inv_ref[...], preferred_element_type=jnp.float32)


def _pallas_stft_denoise_istft(frames, bias_row, strength, fwd_basis, inv_basis):
    T, N = frames.shape
    f2 = fwd_basis.shape[1]          # 2 * Fp
    f_pad = f2 // 2

    # Large frame blocks (MXU row occupancy); tiny inputs run as one block.
    t_block = max(8, min(T_BLOCK_MAX, _round_up(T, 8)))
    t_pad = (-T) % t_block
    frames_p = jnp.pad(frames, ((0, t_pad), (0, 0)))
    tp = T + t_pad

    out = pl.pallas_call(
        _denoiser_kernel,
        out_shape=jax.ShapeDtypeStruct((tp, N), jnp.float32),
        grid_spec=pltpu.PrefetchScalarGridSpec(
            num_scalar_prefetch=1,                              # strength -> SMEM
            grid=(tp // t_block,),
            in_specs=[
                pl.BlockSpec((t_block, N), lambda i, s: (i, 0)),   # frames
                pl.BlockSpec((N, f2), lambda i, s: (0, 0)),        # fused fwd basis
                pl.BlockSpec((f2, N), lambda i, s: (0, 0)),        # fused inv basis
                pl.BlockSpec((1, f_pad), lambda i, s: (0, 0)),     # padded bias spectrum
            ],
            out_specs=pl.BlockSpec((t_block, N), lambda i, s: (i, 0)),
        ),
        compiler_params=pltpu.CompilerParams(
            dimension_semantics=("parallel",),
            vmem_limit_bytes=64 * 1024 * 1024),
    )(jnp.asarray([strength], jnp.float32),
      frames_p, fwd_basis, inv_basis, bias_row)
    return out[:T]


# ------------------------------ post-kernel glue ----------------------------

def _overlap_add_and_trim(win_frames, window_np, n_fft, hop):
    """librosa.istft: overlap-add, divide by window-sum-squares, center-trim.

    Restructured as R = ceil(n_fft/hop) static hop-strided slab adds instead of
    a T*n_fft scatter; the window-sum-square normalization is data independent
    and is computed once in numpy (a constant)."""
    T, _ = win_frames.shape
    out_len = n_fft + hop * (T - 1)
    R = -(-n_fft // hop)
    pad_n = R * hop - n_fft
    wf3 = jnp.pad(win_frames, ((0, 0), (0, pad_n))).reshape(T, R, hop)
    rows = T + R - 1
    y2d = jnp.zeros((rows, hop), jnp.float32)
    for s in range(R):
        y2d = y2d.at[s:s + T].add(wf3[:, s, :])
    y = y2d.reshape(-1)[:out_len]

    # window-sum-squares (numpy, shape-only dependence)
    wsq = np.zeros(R * hop, np.float64)
    wsq[:n_fft] = window_np.astype(np.float64) ** 2
    wsq3 = wsq.reshape(R, hop)
    wss2d = np.zeros((rows, hop), np.float64)
    for s in range(R):
        wss2d[s:s + T] += wsq3[s][None, :]
    wss = wss2d.reshape(-1)[:out_len]
    tiny = np.finfo(np.float32).tiny
    inv_wss = np.where(wss > tiny, 1.0 / np.maximum(wss, tiny), 1.0).astype(np.float32)
    y = y * jnp.asarray(inv_wss)
    return y[n_fft // 2: out_len - n_fft // 2]


class DenoiserDM:
    def __init__(self, key, filter_length=FILTER_LENGTH, hop_length=HOP_LENGTH,
                 win_length=WIN_LENGTH):
        self.n_fft = filter_length
        self.hop = hop_length
        self.win_length = win_length
        (cosb, sinb, icosb, isinb, fwd, inv, window,
         n_freq, f_pad) = _dft_bases(filter_length, win_length)
        self.n_freq = n_freq
        self.f_pad = f_pad
        self.window = window                        # np.float32 [N]
        self.cosb = jnp.asarray(cosb)               # unfused: bias derivation / reference
        self.sinb = jnp.asarray(sinb)
        self.icosb = jnp.asarray(icosb)
        self.isinb = jnp.asarray(isinb)
        self.fwd_basis = jnp.asarray(fwd)           # fused, lane-padded [N, 2*Fp]
        self.inv_basis = jnp.asarray(inv)           # fused, lane-padded [2*Fp, N]

        # TODO(synk): the real module derives bias audio via vocoder.infer(zeros mel,
        # sigma=0); no vocoder checkpoint here, so a deterministic synthetic bias
        # audio is used and its |STFT[:, 0]| taken, matching the original recipe.
        bias_audio = 0.01 * jax.random.normal(key, (filter_length * 4,), jnp.float32)
        bframes, _ = _frame(bias_audio, self.n_fft, self.hop)
        bre = bframes @ self.cosb
        bim = bframes @ self.sinb
        bias_mag = jnp.sqrt(bre * bre + bim * bim)              # [Tb, F]
        self.bias_spec = bias_mag[0].reshape(-1, 1)             # (F, 1), like np reshape(-1, 1)
        self.bias_row = (jnp.zeros((1, f_pad), jnp.float32)
                         .at[0, :n_freq].set(bias_mag[0]))      # lane-padded (1, Fp)

    def __call__(self, audio, strength=0.1):
        y = jnp.asarray(audio, jnp.float32).reshape(-1)         # matches .reshape(-1)
        frames, _ = _frame(y, self.n_fft, self.hop)             # [T, N]
        win_frames = _pallas_stft_denoise_istft(
            frames, self.bias_row, strength, self.fwd_basis, self.inv_basis)
        return _overlap_add_and_trim(win_frames, self.window, self.n_fft, self.hop)


def _ref_forward(dn, audio, strength=0.1):
    """Pure-jnp reference (unfused bases, sqrt/divide path) of the same pipeline."""
    y = jnp.asarray(audio, jnp.float32).reshape(-1)
    frames, _ = _frame(y, dn.n_fft, dn.hop)
    re = frames @ dn.cosb
    im = frames @ dn.sinb
    mag = jnp.sqrt(re * re + im * im)
    nz = mag > 0
    safe = jnp.where(nz, mag, 1.0)
    ph_re = jnp.where(nz, re / safe, 1.0)
    ph_im = jnp.where(nz, im / safe, 0.0)
    mag_d = mag - dn.bias_spec.reshape(1, -1) * strength
    wf = (mag_d * ph_re) @ dn.icosb + (mag_d * ph_im) @ dn.isinb
    return _overlap_add_and_trim(wf, dn.window, dn.n_fft, dn.hop)


if __name__ == "__main__":
    key = jax.random.PRNGKey(0)
    k_bias, k_audio = jax.random.split(key)

    dn = DenoiserDM(k_bias)
    audio = jax.random.normal(k_audio, (1, 2048), jnp.float32)   # (batch, samples)

    out = dn(audio, strength=0.1)
    out = jax.block_until_ready(out)

    ref = jax.block_until_ready(_ref_forward(dn, audio, 0.1))
    np.testing.assert_allclose(np.asarray(out), np.asarray(ref), rtol=2e-3, atol=2e-3)

    print("KERNEL_OK")
</pallas_src>

<mosaic_0001>
module attributes {stable_mosaic.version = 11 : i64} {
  func.func @_denoiser_kernel(%arg0: i32, %arg1: memref<1xf32, #tpu.memory_space<smem>>, %arg2: memref<40x256xf32, #tpu.memory_space<vmem>>, %arg3: memref<256x512xf32, #tpu.memory_space<vmem>>, %arg4: memref<512x256xf32, #tpu.memory_space<vmem>>, %arg5: memref<1x256xf32, #tpu.memory_space<vmem>>, %arg6: memref<40x256xf32, #tpu.memory_space<vmem>>) attributes {dimension_semantics = [#tpu.dimension_semantics<parallel>], iteration_bounds = array<i64: 1>, scalar_prefetch = 1 : i64, scratch_operands = 0 : i64, tpu.core_type = #tpu.core_type<tc>, window_params = [{transform_indices = @transform_0, window_bounds = array<i64: 40, 256>}, {pipeline_mode = #tpu.pipeline_mode<synchronous>, transform_indices = @transform_1, window_bounds = array<i64: 256, 512>}, {pipeline_mode = #tpu.pipeline_mode<synchronous>, transform_indices = @transform_2, window_bounds = array<i64: 512, 256>}, {pipeline_mode = #tpu.pipeline_mode<synchronous>, transform_indices = @transform_3, window_bounds = array<i64: 1, 256>}, {transform_indices = @transform_4, window_bounds = array<i64: 40, 256>}]} {
    %c0 = arith.constant 0 : index
    %c0_0 = arith.constant 0 : index
    %0 = vector.load %arg2[%c0, %c0_0] : memref<40x256xf32, #tpu.memory_space<vmem>>, vector<40x256xf32>
    %c0_1 = arith.constant 0 : index
    %c0_2 = arith.constant 0 : index
    %1 = vector.load %arg3[%c0_1, %c0_2] : memref<256x512xf32, #tpu.memory_space<vmem>>, vector<256x512xf32>
    %cst = arith.constant dense<0.000000e+00> : vector<40x512xf32>
    %2 = tpu.matmul %0, %1, %cst {dimension_numbers = #tpu.dot_dimension_numbers<[1], [0], [0], [1], [0, 0, 1, 1], [], []>} : vector<40x256xf32>, vector<256x512xf32>, vector<40x512xf32> -> vector<40x512xf32>
    %3 = vector.extract_strided_slice %2 {offsets = [0, 0], sizes = [40, 256], strides = [1, 1]} : vector<40x512xf32> to vector<40x256xf32>
    %4 = vector.extract_strided_slice %2 {offsets = [0, 256], sizes = [40, 256], strides = [1, 1]} : vector<40x512xf32> to vector<40x256xf32>
    %5 = arith.mulf %3, %3 : vector<40x256xf32>
    %6 = arith.mulf %4, %4 : vector<40x256xf32>
    %7 = arith.addf %5, %6 : vector<40x256xf32>
    %cst_3 = arith.constant 0.000000e+00 : f32
    %8 = vector.broadcast %cst_3 : f32 to vector<40x256xf32>
    %9 = arith.cmpf ogt, %7, %8 : vector<40x256xf32>
    %cst_4 = arith.constant 1.000000e+00 : f32
    %10 = vector.broadcast %cst_4 : f32 to vector<40x256xf32>
    %11 = arith.select %9, %7, %10 : vector<40x256xi1>, vector<40x256xf32>
    %12 = math.rsqrt %11 : vector<40x256xf32>
    %cst_5 = arith.constant 0.000000e+00 : f32
    %13 = vector.broadcast %cst_5 : f32 to vector<40x256xf32>
    %14 = arith.select %9, %12, %13 : vector<40x256xi1>, vector<40x256xf32>
    %15 = arith.mulf %7, %14 : vector<40x256xf32>
    %16 = arith.mulf %3, %14 : vector<40x256xf32>
    %cst_6 = arith.constant 1.000000e+00 : f32
    %17 = vector.broadcast %cst_6 : f32 to vector<40x256xf32>
    %18 = arith.select %9, %16, %17 : vector<40x256xi1>, vector<40x256xf32>
    %19 = arith.mulf %4, %14 : vector<40x256xf32>
    %c0_7 = arith.constant 0 : index
    %c0_8 = arith.constant 0 : index
    %20 = vector.load %arg5[%c0_7, %c0_8] : memref<1x256xf32, #tpu.memory_space<vmem>>, vector<1x256xf32>
    %c0_9 = arith.constant 0 : index
    %21 = memref.load %arg1[%c0_9] : memref<1xf32, #tpu.memory_space<smem>>
    %22 = vector.broadcast %21 : f32 to vector<1x256xf32>
    %23 = arith.mulf %20, %22 : vector<1x256xf32>
    %24 = vector.broadcast %23 : vector<1x256xf32> to vector<40x256xf32>
    %25 = arith.subf %15, %24 : vector<40x256xf32>
    %26 = arith.mulf %25, %18 : vector<40x256xf32>
    %27 = arith.mulf %25, %19 : vector<40x256xf32>
    %28 = tpu.concatenate %26, %27 in 1 : vector<40x256xf32>, vector<40x256xf32> -> vector<40x512xf32>
    %c0_10 = arith.constant 0 : index
    %c0_11 = arith.constant 0 : index
    %29 = vector.load %arg4[%c0_10, %c0_11] : memref<512x256xf32, #tpu.memory_space<vmem>>, vector<512x256xf32>
    %cst_12 = arith.constant dense<0.000000e+00> : vector<40x256xf32>
    %30 = tpu.matmul %28, %29, %cst_12 {dimension_numbers = #tpu.dot_dimension_numbers<[1], [0], [0], [1], [0, 0, 1, 1], [], []>} : vector<40x512xf32>, vector<512x256xf32>, vector<40x256xf32> -> vector<40x256xf32>
    %c0_13 = arith.constant 0 : index
    %c0_14 = arith.constant 0 : index
    %31 = vector.load %arg6[%c0_13, %c0_14] : memref<40x256xf32, #tpu.memory_space<vmem>>, vector<40x256xf32>
    tpu.vector_store %arg6[%c0_13, %c0_14], %30 {strides = array<i32>} : memref<40x256xf32, #tpu.memory_space<vmem>>, vector<40x256xf32>,
    return
  }
  func.func @transform_0(%arg0: i32, %arg1: memref<1xf32, #tpu.memory_space<smem>>) -> (i32, i32) {
    %c0_i32 = arith.constant 0 : i32
    %c0_i32_0 = arith.constant 0 : i32
    return %arg0, %c0_i32 : i32, i32
  }
  func.func @transform_1(%arg0: i32, %arg1: memref<1xf32, #tpu.memory_space<smem>>) -> (i32, i32) {
    %c0_i32 = arith.constant 0 : i32
    %c0_i32_0 = arith.constant 0 : i32
    %c0_i32_1 = arith.constant 0 : i32
    return %c0_i32, %c0_i32_0 : i32, i32
  }
  func.func @transform_2(%arg0: i32, %arg1: memref<1xf32, #tpu.memory_space<smem>>) -> (i32, i32) {
    %c0_i32 = arith.constant 0 : i32
    %c0_i32_0 = arith.constant 0 : i32
    %c0_i32_1 = arith.constant 0 : i32
    return %c0_i32, %c0_i32_0 : i32, i32
  }
  func.func @transform_3(%arg0: i32, %arg1: memref<1xf32, #tpu.memory_space<smem>>) -> (i32, i32) {
    %c0_i32 = arith.constant 0 : i32
    %c0_i32_0 = arith.constant 0 : i32
    %c0_i32_1 = arith.constant 0 : i32
    return %c0_i32, %c0_i32_0 : i32, i32
  }
  func.func @transform_4(%arg0: i32, %arg1: memref<1xf32, #tpu.memory_space<smem>>) -> (i32, i32) {
    %c0_i32 = arith.constant 0 : i32
    %c0_i32_0 = arith.constant 0 : i32
    return %arg0, %c0_i32 : i32, i32
  }
}

</mosaic_0001>

<bundles_post_ra>
// kernel: tpu_custom_call.1
= control target key start
LH: loop header
LB: loop body
LE: loop exit
PB: predicated region body
PF: predicated region fallthrough
CT: control target
= control target key end

     0   :  { %11 = vsyncpa [#allocation5], 0  ;;  %s1924_s0 = inlined_call_operand.<no memory space> [shape: f32[1], index: 0, kind: input, shape index: {}]   ;;  %s1925_s1 = inlined_call_operand.hbm [shape: f32[40,256], index: 1, kind: input, shape index: {}]   ;;  %s1926_s2 = inlined_call_operand.hbm [shape: f32[256,512], index: 2, kind: input, shape index: {}]   ;;  %s1927_s3 = inlined_call_operand.hbm [shape: f32[512,256], index: 3, kind: input, shape index: {}]   ;;  %s1928_s4 = inlined_call_operand.vmem [shape: f32[1,256], index: 4, kind: input, shape index: {}]   ;;  %s1929_s5 = inlined_call_operand.hbm [shape: f32[40,256], index: 5, kind: output, shape index: {}]  }
   0x1   :  { %12 = vsyncpa [#allocation8], 0  ;;  %s31_s20 = sshll.u32 %s1926_s2, 4  ;;  %s32_s20 = int_to_ptr.hbm [resolvable:$true] %s31_s20 }
   0x2   :  { %13 = vsyncpa [#allocation6], 0  ;;  %s1244_s21 = smov [#allocation7]   ;;  %s18_s25 = sshll.u32 %s1925_s1, 4  ;;  %s19_s25 = int_to_ptr.hbm [resolvable:$true] %s18_s25 }
   0x3   :  { %s33_s22 = sshll.u32 %s1244_s21, 4  ;;  %s1245_s26 = smov 512   ;;  %s34_s22 = int_to_ptr.vmem [resolvable:$true] %s33_s22 }
   0x4   :  { %s1246_s27 = smov 32   ;;  %s1247_s28 = smov [#allocation4]  }
   0x5   :  { %39 = dma.hbm_to_vmem [thread:$0]  %s32_s20, 16384, %s34_s22, [#allocation8], %s1245_s26, %s1245_s26, %s1246_s27  }
   0x6   :  { %s20_s29 = sshll.u32 %s1247_s28, 4  ;;  %s1248_s30 = smov 256   ;;  %s21_s29 = int_to_ptr.vmem [resolvable:$true] %s20_s29 }
   0x7   :  { %s1249_s6 = smov 16   ;;  %s44_s8 = sshll.u32 %s1927_s3, 4  ;;  %s45_s8 = int_to_ptr.hbm [resolvable:$true] %s44_s8 }
   0x8   :  { %26 = dma.hbm_to_vmem [thread:$0]  %s19_s25, 1280, %s21_s29, [#allocation5], %s1248_s30, %s1248_s30, %s1249_s6  }
   0x9   :  { %s1250_s9 = smov [#allocation9]  }
   0xa   :  { %s46_s1 = sshll.u32 %s1250_s9, 4  ;;  %s47_s1 = int_to_ptr.vmem [resolvable:$true] %s46_s1 }
   0xb   :  { %52 = dma.hbm_to_vmem [thread:$0]  %s45_s8, 16384, %s47_s1, [#allocation8], %s1248_s30, %s1248_s30, %s1249_s6  }
   0xc   :  { %1238 = dma.done.wait [#allocation5], 1280  }
   0xd   :  { %1239 = vsyncadd [#allocation5], 4294966016 }
   0xe   :  { %1240 = dma.done.wait [#allocation8], 32768  }
   0xf   :  { %1241 = vsyncadd [#allocation8], 4294934528  ;;  %v137_v0 = vld [vmem:[#allocation7 + $0x1e0] sm:$0xff]  ;;  %v138_v2 = vld [vmem:[#allocation7 + $0x1e8] sm:$0xff]  ;;  %s1100_s15 = sshll.u32 %s1929_s5, 4  ;;  %s1101_s15 = int_to_ptr.hbm [resolvable:$true] %s1100_s15 }
  0x10   :  { %v201_v1 = vld [vmem:[#allocation7 + $0x3e0] sm:$0xff]  ;;  %205 = vmatpush.msra.mxu0 %v137_v0  ;;  %v202_v3 = vld [vmem:[#allocation7 + $0x3e8] sm:$0xff]  ;;  %269 = vmatpush.msra.mxu2 %v138_v2  ;;  %v1297_v0 = vld [vmem:[#allocation4] sm:$0xff] }
  0x11   :  { %237 = vmatpush.msra.mxu1 %v201_v1  ;;  %v133_v4 = vld [vmem:[#allocation7 + $0x1c0] sm:$0xff]  ;;  %301 = vmatpush.msra.mxu3 %v202_v3  ;;  %v134_v6 = vld [vmem:[#allocation7 + $0x1c8] sm:$0xff]  ;;  %v1299_v1 = vld [vmem:[#allocation4 + $0x8] sm:$0xff] }
  0x12   :  { %v197_v5 = vld [vmem:[#allocation7 + $0x3c0] sm:$0xff]  ;;  %v198_v7 = vld [vmem:[#allocation7 + $0x3c8] sm:$0xff]  ;;  %206 = vmatpush.msra.mxu0 %v133_v4  ;;  %270 = vmatpush.msra.mxu2 %v134_v6  ;;  %v140_v2 = vld [vmem:[#allocation7 + $0x1f8] sm:$0xff] }
  0x13   :  { %v129_v8 = vld [vmem:[#allocation7 + $0x1a0] sm:$0xff]  ;;  %238 = vmatpush.msra.mxu1 %v197_v5  ;;  %v130_v10 = vld [vmem:[#allocation7 + $0x1a8] sm:$0xff]  ;;  %302 = vmatpush.msra.mxu3 %v198_v7  ;;  %v204_v3 = vld [vmem:[#allocation7 + $0x3f8] sm:$0xff] }
  0x14   :  { %v193_v9 = vld [vmem:[#allocation7 + $0x3a0] sm:$0xff]  ;;  %v194_v11 = vld [vmem:[#allocation7 + $0x3a8] sm:$0xff]  ;;  %207 = vmatpush.msra.mxu0 %v129_v8  ;;  %271 = vmatpush.msra.mxu2 %v130_v10  ;;  %v139_v4 = vld [vmem:[#allocation7 + $0x1f0] sm:$0xff] }
  0x15   :  { %v125_v12 = vld [vmem:[#allocation7 + $0x180] sm:$0xff]  ;;  %239 = vmatpush.msra.mxu1 %v193_v9  ;;  %v126_v14 = vld [vmem:[#allocation7 + $0x188] sm:$0xff]  ;;  %303 = vmatpush.msra.mxu3 %v194_v11  ;;  %v203_v5 = vld [vmem:[#allocation7 + $0x3f0] sm:$0xff] }
  0x16   :  { %v189_v13 = vld [vmem:[#allocation7 + $0x380] sm:$0xff]  ;;  %v190_v15 = vld [vmem:[#allocation7 + $0x388] sm:$0xff]  ;;  %208 = vmatpush.msra.mxu0 %v125_v12  ;;  %272 = vmatpush.msra.mxu2 %v126_v14  ;;  %v136_v6 = vld [vmem:[#allocation7 + $0x1d8] sm:$0xff] }
  0x17   :  { %v121_v16 = vld [vmem:[#allocation7 + $0x160] sm:$0xff]  ;;  %240 = vmatpush.msra.mxu1 %v189_v13  ;;  %v122_v18 = vld [vmem:[#allocation7 + $0x168] sm:$0xff]  ;;  %304 = vmatpush.msra.mxu3 %v190_v15  ;;  %v200_v7 = vld [vmem:[#allocation7 + $0x3d8] sm:$0xff] }
  0x18   :  { %v185_v17 = vld [vmem:[#allocation7 + $0x360] sm:$0xff]  ;;  %v186_v19 = vld [vmem:[#allocation7 + $0x368] sm:$0xff]  ;;  %209 = vmatpush.msra.mxu0 %v121_v16  ;;  %273 = vmatpush.msra.mxu2 %v122_v18  ;;  %v135_v8 = vld [vmem:[#allocation7 + $0x1d0] sm:$0xff] }
  0x19   :  { %v117_v20 = vld [vmem:[#allocation7 + $0x140] sm:$0xff]  ;;  %241 = vmatpush.msra.mxu1 %v185_v17  ;;  %v118_v22 = vld [vmem:[#allocation7 + $0x148] sm:$0xff]  ;;  %305 = vmatpush.msra.mxu3 %v186_v19  ;;  %v199_v9 = vld [vmem:[#allocation7 + $0x3d0] sm:$0xff] }
  0x1a   :  { %v181_v21 = vld [vmem:[#allocation7 + $0x340] sm:$0xff]  ;;  %v182_v23 = vld [vmem:[#allocation7 + $0x348] sm:$0xff]  ;;  %210 = vmatpush.msra.mxu0 %v117_v20  ;;  %274 = vmatpush.msra.mxu2 %v118_v22  ;;  %v132_v10 = vld [vmem:[#allocation7 + $0x1b8] sm:$0xff] }
  0x1b   :  { %v113_v24 = vld [vmem:[#allocation7 + $0x120] sm:$0xff]  ;;  %242 = vmatpush.msra.mxu1 %v181_v21  ;;  %v114_v26 = vld [vmem:[#allocation7 + $0x128] sm:$0xff]  ;;  %306 = vmatpush.msra.mxu3 %v182_v23  ;;  %v196_v11 = vld [vmem:[#allocation7 + $0x3b8] sm:$0xff] }
  0x1c   :  { %v177_v25 = vld [vmem:[#allocation7 + $0x320] sm:$0xff]  ;;  %v178_v27 = vld [vmem:[#allocation7 + $0x328] sm:$0xff]  ;;  %211 = vmatpush.msra.mxu0 %v113_v24  ;;  %275 = vmatpush.msra.mxu2 %v114_v26  ;;  %v131_v12 = vld [vmem:[#allocation7 + $0x1b0] sm:$0xff] }
  0x1d   :  { %v109_v28 = vld [vmem:[#allocation7 + $0x100] sm:$0xff]  ;;  %243 = vmatpush.msra.mxu1 %v177_v25  ;;  %v110_v30 = vld [vmem:[#allocation7 + $0x108] sm:$0xff]  ;;  %307 = vmatpush.msra.mxu3 %v178_v27  ;;  %v195_v13 = vld [vmem:[#allocation7 + $0x3b0] sm:$0xff] }
  0x1e   :  { %v173_v29 = vld [vmem:[#allocation7 + $0x300] sm:$0xff]  ;;  %v174_v31 = vld [vmem:[#allocation7 + $0x308] sm:$0xff]  ;;  %212 = vmatpush.msra.mxu0 %v109_v28  ;;  %276 = vmatpush.msra.mxu2 %v110_v30  ;;  %v128_v16 = vld [vmem:[#allocation7 + $0x198] sm:$0xff] }
  0x1f   :  { %v105_v32 = vld [vmem:[#allocation7 + $0xe0] sm:$0xff]  ;;  %244 = vmatpush.msra.mxu1 %v173_v29  ;;  %v106_v34 = vld [vmem:[#allocation7 + $0xe8] sm:$0xff]  ;;  %308 = vmatpush.msra.mxu3 %v174_v31  ;;  %v192_v17 = vld [vmem:[#allocation7 + $0x398] sm:$0xff] }
  0x20   :  { %v169_v33 = vld [vmem:[#allocation7 + $0x2e0] sm:$0xff]  ;;  %v170_v35 = vld [vmem:[#allocation7 + $0x2e8] sm:$0xff]  ;;  %213 = vmatpush.msra.mxu0 %v105_v32  ;;  %277 = vmatpush.msra.mxu2 %v106_v34  ;;  %v127_v18 = vld [vmem:[#allocation7 + $0x190] sm:$0xff] }
  0x21   :  { %v101_v36 = vld [vmem:[#allocation7 + $0xc0] sm:$0xff]  ;;  %245 = vmatpush.msra.mxu1 %v169_v33  ;;  %v102_v38 = vld [vmem:[#allocation7 + $0xc8] sm:$0xff]  ;;  %309 = vmatpush.msra.mxu3 %v170_v35  ;;  %v191_v19 = vld [vmem:[#allocation7 + $0x390] sm:$0xff] }
  0x22   :  { %v165_v37 = vld [vmem:[#allocation7 + $0x2c0] sm:$0xff]  ;;  %v166_v39 = vld [vmem:[#allocation7 + $0x2c8] sm:$0xff]  ;;  %214 = vmatpush.msra.mxu0 %v101_v36  ;;  %278 = vmatpush.msra.mxu2 %v102_v38  ;;  %v124_v20 = vld [vmem:[#allocation7 + $0x178] sm:$0xff] }
  0x23   :  { %v97_v40 = vld [vmem:[#allocation7 + $0xa0] sm:$0xff]  ;;  %246 = vmatpush.msra.mxu1 %v165_v37  ;;  %v98_v42 = vld [vmem:[#allocation7 + $0xa8] sm:$0xff]  ;;  %310 = vmatpush.msra.mxu3 %v166_v39  ;;  %v188_v21 = vld [vmem:[#allocation7 + $0x378] sm:$0xff] }
  0x24   :  { %v161_v41 = vld [vmem:[#allocation7 + $0x2a0] sm:$0xff]  ;;  %v162_v43 = vld [vmem:[#allocation7 + $0x2a8] sm:$0xff]  ;;  %215 = vmatpush.msra.mxu0 %v97_v40  ;;  %279 = vmatpush.msra.mxu2 %v98_v42  ;;  %v123_v22 = vld [vmem:[#allocation7 + $0x170] sm:$0xff] }
  0x25   :  { %v93_v44 = vld [vmem:[#allocation7 + $0x80] sm:$0xff]  ;;  %247 = vmatpush.msra.mxu1 %v161_v41  ;;  %v94_v46 = vld [vmem:[#allocation7 + $0x88] sm:$0xff]  ;;  %311 = vmatpush.msra.mxu3 %v162_v43  ;;  %v187_v23 = vld [vmem:[#allocation7 + $0x370] sm:$0xff] }
  0x26   :  { %v157_v45 = vld [vmem:[#allocation7 + $0x280] sm:$0xff]  ;;  %v158_v47 = vld [vmem:[#allocation7 + $0x288] sm:$0xff]  ;;  %216 = vmatpush.msra.mxu0 %v93_v44  ;;  %280 = vmatpush.msra.mxu2 %v94_v46  ;;  %v120_v24 = vld [vmem:[#allocation7 + $0x158] sm:$0xff] }
  0x27   :  { %v89_v48 = vld [vmem:[#allocation7 + $0x60] sm:$0xff]  ;;  %248 = vmatpush.msra.mxu1 %v157_v45  ;;  %v90_v50 = vld [vmem:[#allocation7 + $0x68] sm:$0xff]  ;;  %312 = vmatpush.msra.mxu3 %v158_v47  ;;  %v184_v25 = vld [vmem:[#allocation7 + $0x358] sm:$0xff] }
  0x28   :  { %v153_v49 = vld [vmem:[#allocation7 + $0x260] sm:$0xff]  ;;  %v154_v51 = vld [vmem:[#allocation7 + $0x268] sm:$0xff]  ;;  %217 = vmatpush.msra.mxu0 %v89_v48  ;;  %281 = vmatpush.msra.mxu2 %v90_v50  ;;  %v119_v26 = vld [vmem:[#allocation7 + $0x150] sm:$0xff] }
  0x29   :  { %v85_v52 = vld [vmem:[#allocation7 + $0x40] sm:$0xff]  ;;  %249 = vmatpush.msra.mxu1 %v153_v49  ;;  %v86_v54 = vld [vmem:[#allocation7 + $0x48] sm:$0xff]  ;;  %313 = vmatpush.msra.mxu3 %v154_v51  ;;  %v183_v27 = vld [vmem:[#allocation7 + $0x350] sm:$0xff] }
  0x2a   :  { %v149_v53 = vld [vmem:[#allocation7 + $0x240] sm:$0xff]  ;;  %v150_v55 = vld [vmem:[#allocation7 + $0x248] sm:$0xff]  ;;  %218 = vmatpush.msra.mxu0 %v85_v52  ;;  %282 = vmatpush.msra.mxu2 %v86_v54  ;;  %v116_v28 = vld [vmem:[#allocation7 + $0x138] sm:$0xff] }
  0x2b   :  { %v81_v56 = vld [vmem:[#allocation7 + $0x20] sm:$0xff]  ;;  %250 = vmatpush.msra.mxu1 %v149_v53  ;;  %v82_v58 = vld [vmem:[#allocation7 + $0x28] sm:$0xff]  ;;  %314 = vmatpush.msra.mxu3 %v150_v55  ;;  %v180_v29 = vld [vmem:[#allocation7 + $0x338] sm:$0xff] }
  0x2c   :  { %v145_v57 = vld [vmem:[#allocation7 + $0x220] sm:$0xff]  ;;  %v146_v59 = vld [vmem:[#allocation7 + $0x228] sm:$0xff]  ;;  %219 = vmatpush.msra.mxu0 %v81_v56  ;;  %283 = vmatpush.msra.mxu2 %v82_v58  ;;  %v1313_v30 = vld [vmem:[#allocation4 + $0x20] sm:$0xff] }
  0x2d   :  { %v77_v60 = vld [vmem:[#allocation7] sm:$0xff]  ;;  %251 = vmatpush.msra.mxu1 %v145_v57  ;;  %v78_v62 = vld [vmem:[#allocation7 + $0x8] sm:$0xff]  ;;  %315 = vmatpush.msra.mxu3 %v146_v59  ;;  %v1315_v31 = vld [vmem:[#allocation4 + $0x28] sm:$0xff] }
  0x2e   :  { %v141_v61 = vld [vmem:[#allocation7 + $0x200] sm:$0xff]  ;;  %v142_v63 = vld [vmem:[#allocation7 + $0x208] sm:$0xff]  ;;  %220 = vmatpush.msra.mxu0 %v77_v60  ;;  %284 = vmatpush.msra.mxu2 %v78_v62  ;;  %v112_v32 = vld [vmem:[#allocation7 + $0x118] sm:$0xff] }
  0x2f   :  { %252 = vmatpush.msra.mxu1 %v141_v61  ;;  %316 = vmatpush.msra.mxu3 %v142_v63  ;;  %v1305_v14 = vld [vmem:[#allocation4 + $0x10] sm:$0xff]  ;;  %v1307_v15 = vld [vmem:[#allocation4 + $0x18] sm:$0xff]  ;;  %v176_v33 = vld [vmem:[#allocation7 + $0x318] sm:$0xff] }
  0x30   :  { %221 = vmatmul.f32.vlgmr.msra.gmra.mxu0 %v1297_v0  ;;  %253 = vmatmul.f32.vlgmr.msra.gmra.mxu1 %v1299_v1  ;;  %v115_v34 = vld [vmem:[#allocation7 + $0x130] sm:$0xff]  ;;  %v108_v36 = vld [vmem:[#allocation7 + $0xf8] sm:$0xff]  ;;  %v1321_v44 = vld [vmem:[#allocation4 + $0x30] sm:$0xff] }
  0x31   :  { %285 = vmatmul.f32.vlgmr.msra.gmra.mxu2 %v1297_v0  ;;  %317 = vmatmul.f32.vlgmr.msra.gmra.mxu3 %v1299_v1  ;;  %v179_v35 = vld [vmem:[#allocation7 + $0x330] sm:$0xff]  ;;  %v172_v37 = vld [vmem:[#allocation7 + $0x2f8] sm:$0xff]  ;;  %v1323_v45 = vld [vmem:[#allocation4 + $0x38] sm:$0xff] }
  0x32   :  { %397 = vmatpush.msrb.mxu2 %v140_v2  ;;  %429 = vmatpush.msrb.mxu3 %v204_v3  ;;  %v111_v38 = vld [vmem:[#allocation7 + $0x110] sm:$0xff]  ;;  %v104_v40 = vld [vmem:[#allocation7 + $0xd8] sm:$0xff] }
  0x33   :  { %333 = vmatpush.msrb.mxu0 %v139_v4  ;;  %365 = vmatpush.msrb.mxu1 %v203_v5  ;;  %v175_v39 = vld [vmem:[#allocation7 + $0x310] sm:$0xff]  ;;  %v168_v41 = vld [vmem:[#allocation7 + $0x2d8] sm:$0xff] }
  0x34   :  { %398 = vmatpush.msrb.mxu2 %v136_v6  ;;  %430 = vmatpush.msrb.mxu3 %v200_v7  ;;  %v107_v42 = vld [vmem:[#allocation7 + $0xf0] sm:$0xff]  ;;  %v100_v46 = vld [vmem:[#allocation7 + $0xb8] sm:$0xff] }
  0x35   :  { %334 = vmatpush.msrb.mxu0 %v135_v8  ;;  %366 = vmatpush.msrb.mxu1 %v199_v9  ;;  %v171_v43 = vld [vmem:[#allocation7 + $0x2f0] sm:$0xff]  ;;  %v164_v47 = vld [vmem:[#allocation7 + $0x2b8] sm:$0xff] }
  0x36   :  { %399 = vmatpush.msrb.mxu2 %v132_v10  ;;  %431 = vmatpush.msrb.mxu3 %v196_v11  ;;  %v103_v48 = vld [vmem:[#allocation7 + $0xd0] sm:$0xff]  ;;  %v96_v50 = vld [vmem:[#allocation7 + $0x98] sm:$0xff] }
  0x37   :  { %335 = vmatpush.msrb.mxu0 %v131_v12  ;;  %367 = vmatpush.msrb.mxu1 %v195_v13  ;;  %v167_v49 = vld [vmem:[#allocation7 + $0x2d0] sm:$0xff]  ;;  %v160_v51 = vld [vmem:[#allocation7 + $0x298] sm:$0xff] }
  0x38   :  { %224 = vmatmul.f32.gmra.mxu0 %v1305_v14  ;;  %256 = vmatmul.f32.gmra.mxu1 %v1307_v15  ;;  %v99_v52 = vld [vmem:[#allocation7 + $0xb0] sm:$0xff]  ;;  %v92_v54 = vld [vmem:[#allocation7 + $0x78] sm:$0xff] }
  0x39   :  { %288 = vmatmul.f32.gmra.mxu2 %v1305_v14  ;;  %320 = vmatmul.f32.gmra.mxu3 %v1307_v15  ;;  %v163_v53 = vld [vmem:[#allocation7 + $0x2b0] sm:$0xff]  ;;  %v156_v55 = vld [vmem:[#allocation7 + $0x278] sm:$0xff] }
  0x3a   :  { %400 = vmatpush.msrb.mxu2 %v128_v16  ;;  %432 = vmatpush.msrb.mxu3 %v192_v17  ;;  %v95_v56 = vld [vmem:[#allocation7 + $0x90] sm:$0xff]  ;;  %v76_v59 = vld [vmem:[#allocation4 + $0x48] sm:$0xff] }
  0x3b   :  { %336 = vmatpush.msrb.mxu0 %v127_v18  ;;  %368 = vmatpush.msrb.mxu1 %v191_v19  ;;  %v159_v57 = vld [vmem:[#allocation7 + $0x290] sm:$0xff]  ;;  %v88_v62 = vld [vmem:[#allocation7 + $0x58] sm:$0xff] }
  0x3c   :  { %401 = vmatpush.msrb.mxu2 %v124_v20  ;;  %433 = vmatpush.msrb.mxu3 %v188_v21  ;;  %v75_v58 = vld [vmem:[#allocation4 + $0x40] sm:$0xff]  ;;  %v152_v63 = vld [vmem:[#allocation7 + $0x258] sm:$0xff]  ;;  %v792_v20 = vld [vmem:[#allocation9 + $0x2e0] sm:$0xff] }
  0x3d   :  { %337 = vmatpush.msrb.mxu0 %v123_v22  ;;  %369 = vmatpush.msrb.mxu1 %v187_v23  ;;  %v91_v60 = vld [vmem:[#allocation7 + $0x70] sm:$0xff]  ;;  %v84_v4 = vld [vmem:[#allocation7 + $0x38] sm:$0xff]  ;;  %v728_v21 = vld [vmem:[#allocation9 + $0xe0] sm:$0xff] }
  0x3e   :  { %402 = vmatpush.msrb.mxu2 %v120_v24  ;;  %434 = vmatpush.msrb.mxu3 %v184_v25  ;;  %v155_v61 = vld [vmem:[#allocation7 + $0x270] sm:$0xff]  ;;  %v148_v5 = vld [vmem:[#allocation7 + $0x238] sm:$0xff] }
  0x3f   :  { %338 = vmatpush.msrb.mxu0 %v119_v26  ;;  %370 = vmatpush.msrb.mxu1 %v183_v27  ;;  %v87_v2 = vld [vmem:[#allocation7 + $0x50] sm:$0xff]  ;;  %v80_v8 = vld [vmem:[#allocation7 + $0x18] sm:$0xff] }
  0x40   :  { %403 = vmatpush.msrb.mxu2 %v116_v28  ;;  %435 = vmatpush.msrb.mxu3 %v180_v29  ;;  %v151_v3 = vld [vmem:[#allocation7 + $0x250] sm:$0xff]  ;;  %v144_v9 = vld [vmem:[#allocation7 + $0x218] sm:$0xff]  ;;  %v788_v28 = vld [vmem:[#allocation9 + $0x2c0] sm:$0xff] }
  0x41   :  { %227 = vmatmul.f32.gmra.mxu0 %v1313_v30  ;;  %259 = vmatmul.f32.gmra.mxu1 %v1315_v31  ;;  %v83_v6 = vld [vmem:[#allocation7 + $0x30] sm:$0xff]  ;;  %v724_v29 = vld [vmem:[#allocation9 + $0xc0] sm:$0xff] }
  0x42   :  { %291 = vmatmul.f32.gmra.mxu2 %v1313_v30  ;;  %323 = vmatmul.f32.gmra.mxu3 %v1315_v31  ;;  %v147_v7 = vld [vmem:[#allocation7 + $0x230] sm:$0xff] }
  0x43   :  { %404 = vmatpush.msrb.mxu2 %v112_v32  ;;  %436 = vmatpush.msrb.mxu3 %v176_v33  ;;  %v79_v10 = vld [vmem:[#allocation7 + $0x10] sm:$0xff] }
  0x44   :  { %339 = vmatpush.msrb.mxu0 %v115_v34  ;;  %371 = vmatpush.msrb.mxu1 %v179_v35  ;;  %v143_v11 = vld [vmem:[#allocation7 + $0x210] sm:$0xff] }
  0x45   :  { %405 = vmatpush.msrb.mxu2 %v108_v36  ;;  %437 = vmatpush.msrb.mxu3 %v172_v37  ;;  %v794_v16 = vld [vmem:[#allocation9 + $0x2f0] sm:$0xff]  ;;  %v784_v36 = vld [vmem:[#allocation9 + $0x2a0] sm:$0xff] }
  0x46   :  { %340 = vmatpush.msrb.mxu0 %v111_v38  ;;  %372 = vmatpush.msrb.mxu1 %v175_v39  ;;  %v730_v17 = vld [vmem:[#allocation9 + $0xf0] sm:$0xff]  ;;  %v720_v39 = vld [vmem:[#allocation9 + $0xa0] sm:$0xff] }
  0x47   :  { %406 = vmatpush.msrb.mxu2 %v104_v40  ;;  %438 = vmatpush.msrb.mxu3 %v168_v41  ;;  %v790_v24 = vld [vmem:[#allocation9 + $0x2d0] sm:$0xff] }
  0x48   :  { %341 = vmatpush.msrb.mxu0 %v107_v42  ;;  %373 = vmatpush.msrb.mxu1 %v171_v43  ;;  %v726_v25 = vld [vmem:[#allocation9 + $0xd0] sm:$0xff]  ;;  %v820_v42 = vld [vmem:[#allocation9 + $0x3c0] sm:$0xff] }
  0x49   :  { %230 = vmatmul.f32.gmra.mxu0 %v1321_v44  ;;  %262 = vmatmul.f32.gmra.mxu1 %v1323_v45  ;;  %v826_v26 = vld [vmem:[#allocation9 + $0x3f0] sm:$0xff]  ;;  %v756_v43 = vld [vmem:[#allocation9 + $0x1c0] sm:$0xff] }
  0x4a   :  { %294 = vmatmul.f32.gmra.mxu2 %v1321_v44  ;;  %326 = vmatmul.f32.gmra.mxu3 %v1323_v45  ;;  %v762_v27 = vld [vmem:[#allocation9 + $0x1f0] sm:$0xff] }
  0x4b   :  { %407 = vmatpush.msrb.mxu2 %v100_v46  ;;  %439 = vmatpush.msrb.mxu3 %v164_v47  ;;  %v786_v32 = vld [vmem:[#allocation9 + $0x2b0] sm:$0xff] }
  0x4c   :  { %342 = vmatpush.msrb.mxu0 %v103_v48  ;;  %374 = vmatpush.msrb.mxu1 %v167_v49  ;;  %v722_v33 = vld [vmem:[#allocation9 + $0xb0] sm:$0xff]  ;;  %v816_v48 = vld [vmem:[#allocation9 + $0x3a0] sm:$0xff] }
  0x4d   :  { %408 = vmatpush.msrb.mxu2 %v96_v50  ;;  %440 = vmatpush.msrb.mxu3 %v160_v51  ;;  %v822_v34 = vld [vmem:[#allocation9 + $0x3d0] sm:$0xff]  ;;  %v780_v49 = vld [vmem:[#allocation9 + $0x280] sm:$0xff] }
  0x4e   :  { %343 = vmatpush.msrb.mxu0 %v99_v52  ;;  %375 = vmatpush.msrb.mxu1 %v163_v53  ;;  %v758_v35 = vld [vmem:[#allocation9 + $0x1d0] sm:$0xff]  ;;  %v716_v50 = vld [vmem:[#allocation9 + $0x80] sm:$0xff] }
  0x4f   :  { %409 = vmatpush.msrb.mxu2 %v92_v54  ;;  %441 = vmatpush.msrb.mxu3 %v156_v55  ;;  %v754_v46 = vld [vmem:[#allocation9 + $0x1b0] sm:$0xff]  ;;  %v752_v51 = vld [vmem:[#allocation9 + $0x1a0] sm:$0xff] }
  0x50   :  { %344 = vmatpush.msrb.mxu0 %v95_v56  ;;  %376 = vmatpush.msrb.mxu1 %v159_v57  ;;  %v718_v47 = vld [vmem:[#allocation9 + $0x90] sm:$0xff] }
  0x51   :  { %233 = vmatmul.f32.gmra.mxu0 %v75_v58  ;;  %265 = vmatmul.f32.gmra.mxu1 %v76_v59  ;;  %v778_v52 = vld [vmem:[#allocation9 + $0x270] sm:$0xff] }
  0x52   :  { %297 = vmatmul.f32.gmra.mxu2 %v75_v58  ;;  %329 = vmatmul.f32.gmra.mxu3 %v76_v59  ;;  %v714_v53 = vld [vmem:[#allocation9 + $0x70] sm:$0xff] }
  0x53   :  { %345 = vmatpush.msrb.mxu0 %v91_v60  ;;  %377 = vmatpush.msrb.mxu1 %v155_v61  ;;  %v712_v60 = vld [vmem:[#allocation9 + $0x60] sm:$0xff] }
  0x54   :  { %410 = vmatpush.msrb.mxu2 %v88_v62  ;;  %442 = vmatpush.msrb.mxu3 %v152_v63  ;;  %v776_v61 = vld [vmem:[#allocation9 + $0x260] sm:$0xff] }
  0x55   :  { %346 = vmatpush.msrb.mxu0 %v87_v2  ;;  %378 = vmatpush.msrb.mxu1 %v151_v3  ;;  %v812_v62 = vld [vmem:[#allocation9 + $0x380] sm:$0xff]  ;;  %v710_v2 = vld [vmem:[#allocation9 + $0x50] sm:$0xff] }
  0x56   :  { %411 = vmatpush.msrb.mxu2 %v84_v4  ;;  %443 = vmatpush.msrb.mxu3 %v148_v5  ;;  %v748_v63 = vld [vmem:[#allocation9 + $0x180] sm:$0xff]  ;;  %v774_v3 = vld [vmem:[#allocation9 + $0x250] sm:$0xff] }
  0x57   :  { %347 = vmatpush.msrb.mxu0 %v83_v6  ;;  %379 = vmatpush.msrb.mxu1 %v147_v7  ;;  %v810_v4 = vld [vmem:[#allocation9 + $0x370] sm:$0xff]  ;;  %v808_v6 = vld [vmem:[#allocation9 + $0x360] sm:$0xff] }
  0x58   :  { %412 = vmatpush.msrb.mxu2 %v80_v8  ;;  %444 = vmatpush.msrb.mxu3 %v144_v9  ;;  %v746_v5 = vld [vmem:[#allocation9 + $0x170] sm:$0xff] }
  0x59   :  { %348 = vmatpush.msrb.mxu0 %v79_v10  ;;  %380 = vmatpush.msrb.mxu1 %v143_v11  ;;  %v708_v10 = vld [vmem:[#allocation9 + $0x40] sm:$0xff] }
  0x5a   :  { %349 = vmatmul.f32.vlgmr.msrb.gmra.mxu0 %v1297_v0  ;;  %381 = vmatmul.f32.vlgmr.msrb.gmra.mxu1 %v1299_v1  ;;  %v772_v11 = vld [vmem:[#allocation9 + $0x240] sm:$0xff] }
  0x5b   :  { %413 = vmatmul.f32.vlgmr.msrb.gmra.mxu2 %v1297_v0  ;;  %445 = vmatmul.f32.vlgmr.msrb.gmra.mxu3 %v1299_v1 }
  0x5c   :  { %892 = vmatpush.msra.mxu2 %v794_v16  ;;  %828 = vmatpush.msra.mxu0 %v730_v17 }
  0x5d   :  { %924 = vmatpush.msra.mxu3 %v826_v26  ;;  %860 = vmatpush.msra.mxu1 %v762_v27  ;;  %v742_v27 = vld [vmem:[#allocation9 + $0x150] sm:$0xff] }
  0x5e   :  { %893 = vmatpush.msra.mxu2 %v792_v20  ;;  %829 = vmatpush.msra.mxu0 %v728_v21  ;;  %v744_v21 = vld [vmem:[#allocation9 + $0x160] sm:$0xff] }
  0x60   :  { %894 = vmatpush.msra.mxu2 %v790_v24  ;;  %830 = vmatpush.msra.mxu0 %v726_v25  ;;  %v706_v24 = vld [vmem:[#allocation9 + $0x30] sm:$0xff] }
  0x61   :  { %v770_v25 = vld [vmem:[#allocation9 + $0x230] sm:$0xff] }
  0x62   :  { %352 = vmatmul.f32.gmra.mxu0 %v1305_v14  ;;  %384 = vmatmul.f32.gmra.mxu1 %v1307_v15 }
  0x63   :  { %416 = vmatmul.f32.gmra.mxu2 %v1305_v14  ;;  %448 = vmatmul.f32.gmra.mxu3 %v1307_v15 }
  0x64   :  { %895 = vmatpush.msra.mxu2 %v788_v28  ;;  %831 = vmatpush.msra.mxu0 %v724_v29  ;;  %v704_v28 = vld [vmem:[#allocation9 + $0x20] sm:$0xff] }
  0x65   :  { %v768_v29 = vld [vmem:[#allocation9 + $0x220] sm:$0xff] }
  0x66   :  { %896 = vmatpush.msra.mxu2 %v786_v32  ;;  %832 = vmatpush.msra.mxu0 %v722_v33  ;;  %v740_v32 = vld [vmem:[#allocation9 + $0x140] sm:$0xff]  ;;  %v702_v33 = vld [vmem:[#allocation9 + $0x10] sm:$0xff] }
  0x68   :  { %897 = vmatpush.msra.mxu2 %v784_v36  ;;  %833 = vmatpush.msra.mxu0 %v720_v39 }
  0x6a   :  { %355 = vmatmul.f32.gmra.mxu0 %v1313_v30  ;;  %387 = vmatmul.f32.gmra.mxu1 %v1315_v31 }
  0x6b   :  { %419 = vmatmul.f32.gmra.mxu2 %v1313_v30  ;;  %451 = vmatmul.f32.gmra.mxu3 %v1315_v31  ;;  %v824_v30 = vld [vmem:[#allocation9 + $0x3e0] sm:$0xff] }
  0x6c   :  { %v760_v31 = vld [vmem:[#allocation9 + $0x1e0] sm:$0xff]  ;;  %925 = vmatpush.msra.mxu3 %v824_v30  ;;  %834 = vmatpush.msra.mxu0 %v718_v47 }
  0x6d   :  { %861 = vmatpush.msra.mxu1 %v760_v31  ;;  %v804_v31 = vld [vmem:[#allocation9 + $0x340] sm:$0xff] }
  0x6e   :  { %926 = vmatpush.msra.mxu3 %v822_v34  ;;  %835 = vmatpush.msra.mxu0 %v716_v50 }
  0x6f   :  { %862 = vmatpush.msra.mxu1 %v758_v35  ;;  %v766_v35 = vld [vmem:[#allocation9 + $0x210] sm:$0xff] }
  0x70   :  { %927 = vmatpush.msra.mxu3 %v820_v42  ;;  %836 = vmatpush.msra.mxu0 %v714_v53 }
  0x71   :  { %863 = vmatpush.msra.mxu1 %v756_v43  ;;  %v802_v43 = vld [vmem:[#allocation9 + $0x330] sm:$0xff] }
  0x72   :  { %358 = vmatmul.f32.gmra.mxu0 %v1321_v44  ;;  %390 = vmatmul.f32.gmra.mxu1 %v1323_v45 }
  0x73   :  { %422 = vmatmul.f32.gmra.mxu2 %v1321_v44  ;;  %454 = vmatmul.f32.gmra.mxu3 %v1323_v45  ;;  %v782_v44 = vld [vmem:[#allocation9 + $0x290] sm:$0xff] }
  0x74   :  { %v818_v45 = vld [vmem:[#allocation9 + $0x3b0] sm:$0xff]  ;;  %898 = vmatpush.msra.mxu2 %v782_v44  ;;  %864 = vmatpush.msra.mxu1 %v754_v46 }
  0x75   :  { %928 = vmatpush.msra.mxu3 %v818_v45  ;;  %837 = vmatpush.msra.mxu0 %v712_v60  ;;  %v738_v44 = vld [vmem:[#allocation9 + $0x130] sm:$0xff]  ;;  %v700_v45 = vld [vmem:[#allocation9] sm:$0xff] }
  0x76   :  { %899 = vmatpush.msra.mxu2 %v780_v49  ;;  %865 = vmatpush.msra.mxu1 %v752_v51  ;;  %v736_v49 = vld [vmem:[#allocation9 + $0x120] sm:$0xff] }
  0x77   :  { %929 = vmatpush.msra.mxu3 %v816_v48  ;;  %838 = vmatpush.msra.mxu0 %v710_v2  ;;  %v800_v48 = vld [vmem:[#allocation9 + $0x320] sm:$0xff] }
  0x78   :  { %900 = vmatpush.msra.mxu2 %v778_v52 }
  0x79   :  { %839 = vmatpush.msra.mxu0 %v708_v10 }
  0x7a   :  { %361 = vmatmul.f32.gmra.mxu0 %v75_v58  ;;  %393 = vmatmul.f32.gmra.mxu1 %v76_v59 }
  0x7b   :  { %425 = vmatmul.f32.gmra.mxu2 %v75_v58  ;;  %457 = vmatmul.f32.gmra.mxu3 %v76_v59  ;;  %v814_v58 = vld [vmem:[#allocation9 + $0x390] sm:$0xff] }
  0x7c   :  { %v750_v59 = vld [vmem:[#allocation9 + $0x190] sm:$0xff]  ;;  %930 = vmatpush.msra.mxu3 %v814_v58  ;;  %901 = vmatpush.msra.mxu2 %v776_v61 }
  0x7d   :  { %866 = vmatpush.msra.mxu1 %v750_v59  ;;  %840 = vmatpush.msra.mxu0 %v706_v24  ;;  %v798_v58 = vld [vmem:[#allocation9 + $0x310] sm:$0xff] }
  0x7e   :  { %931 = vmatpush.msra.mxu3 %v812_v62  ;;  %902 = vmatpush.msra.mxu2 %v774_v3  ;;  %v734_v59 = vld [vmem:[#allocation9 + $0x110] sm:$0xff]  ;;  %v796_v62 = vld [vmem:[#allocation9 + $0x300] sm:$0xff] }
  0x7f   :  { %867 = vmatpush.msra.mxu1 %v748_v63  ;;  %841 = vmatpush.msra.mxu0 %v704_v28  ;;  %v732_v63 = vld [vmem:[#allocation9 + $0x100] sm:$0xff]  ;;  %v661_v24 = vld [vmem:[%s1928_s4] sm:$0x3] }
  0x80   :  { %932 = vmatpush.msra.mxu3 %v810_v4  ;;  %903 = vmatpush.msra.mxu2 %v772_v11 }
  0x81   :  { %868 = vmatpush.msra.mxu1 %v746_v5  ;;  %842 = vmatpush.msra.mxu0 %v702_v33 }
  0x82   :  { %933 = vmatpush.msra.mxu3 %v808_v6  ;;  %904 = vmatpush.msra.mxu2 %v770_v25  ;;  %v663_v25 = vstv %s1924_s0  ;;  %s1251_s0 = smov [#allocation10]  }
  0x83   :  { %869 = vmatpush.msra.mxu1 %v744_v21  ;;  %843 = vmatpush.msra.mxu0 %v700_v45  ;;  %s1098_s4 = sshll.u32 %s1251_s0, 4  ;;  %s1099_s4 = int_to_ptr.vmem [resolvable:$true] %s1098_s4 }
  0x84   :  { %905 = vmatpush.msra.mxu2 %v768_v29 }
  0x85   :  { %870 = vmatpush.msra.mxu1 %v742_v27 }
  0x86   :  { %906 = vmatpush.msra.mxu2 %v766_v35  ;;  %v793_v35 = vld [vmem:[#allocation9 + $0x2e8] sm:$0xff] }
  0x87   :  { %871 = vmatpush.msra.mxu1 %v740_v32 }
  0x89   :  { %872 = vmatpush.msra.mxu1 %v738_v44 }
  0x8b   :  { %873 = vmatpush.msra.mxu1 %v736_v49 }
  0x8d   :  { %874 = vmatpush.msra.mxu1 %v734_v59 }
  0x8f   :  { %875 = vmatpush.msra.mxu1 %v732_v63 }
  0xad   :  { %v1345_v0 = vpop.f32.mrf.mxu0  ;;  %v1347_v1 = vpop.f32.mrf.mxu1 }
  0xae   :  { %v1387_v9 = vadd.f32 %v1347_v1, %v1345_v0  ;;  %v806_v1 = vld [vmem:[#allocation9 + $0x350] sm:$0xff] }
  0xaf   :  { %934 = vmatpush.msra.mxu3 %v806_v1 }
  0xb0   :  { %v461_v26 = vmul.f32 %v1387_v9, %v1387_v9 }
  0xb1   :  { %935 = vmatpush.msra.mxu3 %v804_v31 }
  0xb3   :  { %936 = vmatpush.msra.mxu3 %v802_v43 }
  0xb4   :  { %v1349_v12 = vpop.f32.mrf.mxu2  ;;  %v1351_v13 = vpop.f32.mrf.mxu3 }
  0xb5   :  { %v1353_v14 = vpop.f32.mrf.mxu0  ;;  %v1355_v15 = vpop.f32.mrf.mxu1  ;;  %v1399_v34 = vadd.f32 %v1351_v13, %v1349_v12  ;;  %937 = vmatpush.msra.mxu3 %v800_v48  ;;  %v731_v48 = vld [vmem:[#allocation9 + $0xf8] sm:$0xff] }
  0xb6   :  { %v1403_v36 = vadd.f32 %v1355_v15, %v1353_v14  ;;  %v764_v14 = vld [vmem:[#allocation9 + $0x200] sm:$0xff]  ;;  %956 = vmatpush.msrb.mxu0 %v731_v48 }
  0xb7   :  { %907 = vmatpush.msra.mxu2 %v764_v14  ;;  %v462_v50 = vmul.f32 %v1399_v34, %v1399_v34  ;;  %938 = vmatpush.msra.mxu3 %v798_v58 }
  0xb8   :  { %v463_v52 = vmul.f32 %v1403_v36, %v1403_v36 }
  0xb9   :  { %939 = vmatpush.msra.mxu3 %v796_v62 }
  0xbc   :  { %v1357_v18 = vpop.f32.mrf.mxu2  ;;  %v1359_v19 = vpop.f32.mrf.mxu3 }
  0xbd   :  { %v1430_v2 = vadd.f32 %v1359_v19, %v1357_v18 }
  0xbe   :  { %v1361_v22 = vpop.f32.mrf.mxu0  ;;  %v1363_v23 = vpop.f32.mrf.mxu1 }
  0xbf   :  { %v1437_v4 = vadd.f32 %v1363_v23, %v1361_v22 }
  0xc1   :  { %v465_v21 = vmul.f32 %v1437_v4, %v1437_v4 }
  0xc5   :  { %v1365_v37 = vpop.f32.mrf.mxu2  ;;  %v1367_v38 = vpop.f32.mrf.mxu3 }
  0xc6   :  { %v1369_v40 = vpop.f32.mrf.mxu0  ;;  %v1371_v41 = vpop.f32.mrf.mxu1  ;;  %v1447_v19 = vadd.f32 %v1367_v38, %v1365_v37  ;;  %v795_v38 = vld [vmem:[#allocation9 + $0x2f8] sm:$0xff] }
  0xc7   :  { %v1451_v10 = vadd.f32 %v1371_v41, %v1369_v40  ;;  %v464_v40 = vmul.f32 %v1430_v2, %v1430_v2  ;;  %1020 = vmatpush.msrb.mxu2 %v795_v38  ;;  %v791_v38 = vld [vmem:[#allocation9 + $0x2d8] sm:$0xff] }
  0xc8   :  { %v466_v1 = vmul.f32 %v1447_v19, %v1447_v19 }
  0xc9   :  { %v1485_v27 = vmul.f32 %v1451_v10, %v1451_v10  ;;  %1021 = vmatpush.msrb.mxu2 %v793_v35  ;;  %v789_v35 = vld [vmem:[#allocation9 + $0x2c8] sm:$0xff] }
  0xcb   :  { %1022 = vmatpush.msrb.mxu2 %v791_v38  ;;  %v759_v38 = vld [vmem:[#allocation9 + $0x1d8] sm:$0xff] }
  0xcd   :  { %v1373_v54 = vpop.f32.mrf.mxu2  ;;  %v1375_v55 = vpop.f32.mrf.mxu3  ;;  %1023 = vmatpush.msrb.mxu2 %v789_v35  ;;  %v821_v35 = vld [vmem:[#allocation9 + $0x3c8] sm:$0xff] }
  0xce   :  { %v1377_v56 = vpop.f32.mrf.mxu0  ;;  %v1379_v57 = vpop.f32.mrf.mxu1  ;;  %v1489_v29 = vadd.f32 %v1375_v55, %v1373_v54  ;;  %v664_v54 = vmul.f32 %v663_v25, %v661_v24 }
  0xcf   :  { %v1493_v31 = vadd.f32 %v1379_v57, %v1377_v56 }
  0xd0   :  { %v1528_v49 = vmul.f32 %v1489_v29, %v1489_v29  ;;  %v1543_v59 = vperm.slane %v664_v54, 0 }
  0xd5   :  { %v1381_v7 = vpop.f32.mrf.mxu2  ;;  %v1383_v8 = vpop.f32.mrf.mxu3 }
  0xd7   :  { %v350_v16 = vpop.f32.mrf.mxu0  ;;  %v382_v17 = vpop.f32.mrf.mxu1 }
  0xd8   :  { %v1389_v20 = vadd.f32 %v382_v17, %v350_v16 }
  0xda   :  { %v471_v0 = vmul.f32 %v1389_v20, %v1389_v20 }
  0xdc   :  { %v1395_v30 = vadd.f32 %v471_v0, %v461_v26 }
  0xde   :  { %vm491_vm0 = vcmp.gt.f32.partialorder %v1395_v30, 0.0  ;;  %v414_v39 = vpop.f32.mrf.mxu2  ;;  %v446_v42 = vpop.f32.mrf.mxu3 }
  0xdf   :  { %v1409_v12 = vsel %vm491_vm0, %v1395_v30, 1.0  ;;  %v1411_v13 = vadd.f32 %v446_v42, %v414_v39  ;;  %v353_v46 = vpop.f32.mrf.mxu0  ;;  %v385_v47 = vpop.f32.mrf.mxu1  ;;  %v1503_v42 = vadd.f32 %v1383_v8, %v1381_v7 }
  0xe0   :  { %1122 = vrsqrt.f32 %v1409_v12  ;;  %v1414_v15 = vadd.f32 %v385_v47, %v353_v46  ;;  %vm517_vm4 = vweird.f32 %v1409_v12 }
  0xe1   :  { %v472_v51 = vmul.f32 %v1411_v13, %v1411_v13 }
  0xe2   :  { %v473_v53 = vmul.f32 %v1414_v15, %v1414_v15 }
  0xe3   :  { %v1424_v60 = vadd.f32 %v472_v51, %v462_v50 }
  0xe4   :  { %v1426_v61 = vadd.f32 %v473_v53, %v463_v52  ;;  %v827_v52 = vld [vmem:[#allocation9 + $0x3f8] sm:$0xff]  ;;  %v1540_v53 = vmul.f32 %v1493_v31, %v1493_v31 }
  0xe5   :  { %vm492_vm1 = vcmp.gt.f32.partialorder %v1424_v60, 0.0  ;;  %1052 = vmatpush.msrb.mxu3 %v827_v52 }
  0xe6   :  { %v1433_v3 = vpop.eup %1122  ;;  %v1442_v5 = vsel %vm492_vm1, %v1424_v60, 1.0  ;;  %vm493_vm2 = vcmp.gt.f32.partialorder %v1426_v61, 0.0  ;;  %v417_v6 = vpop.f32.mrf.mxu2 }
  0xe7   :  { %v449_v18 = vpop.f32.mrf.mxu3  ;;  %v512_v22 = vmul.f32 %v1433_v3, %v1409_v12  ;;  %1124 = vrsqrt.f32 %v1442_v5  ;;  %v356_v23 = vpop.f32.mrf.mxu0  ;;  %v1459_v16 = vsel %vm493_vm2, %v1426_v61, 1.0  ;;  %vm518_vm3 = vweird.f32 %v1433_v3  ;;  %v729_v12 = vld [vmem:[#allocation9 + $0xe8] sm:$0xff] }
  0xe8   :  { %v388_v11 = vpop.f32.mrf.mxu1  ;;  %v1461_v17 = vadd.f32 %v449_v18, %v417_v6  ;;  %1126 = vrsqrt.f32 %v1459_v16  ;;  %vm519_vm7 = vmor %vm517_vm4, %vm518_vm3  ;;  %957 = vmatpush.msrb.mxu0 %v729_v12  ;;  %vm527_vm9 = vweird.f32 %v1442_v5  ;;  %vm537_vm10 = vweird.f32 %v1459_v16  ;;  %v723_v12 = vld [vmem:[#allocation9 + $0xb8] sm:$0xff] }
  0xe9   :  { %v1463_v37 = vadd.f32 %v388_v11, %v356_v23  ;;  %v513_v41 = vmul.f32 %v1433_v3, %v512_v22  ;;  %v1553_v22 = vmul.f32 %v1503_v42, %v1503_v42  ;;  %v1556_v23 = vperm.slane %v664_v54, 1 }
  0xea   :  { %v474_v26 = vmul.f32 %v1461_v17, %v1461_v17 }
  0xeb   :  { %v475_v0 = vmul.f32 %v1463_v37, %v1463_v37  ;;  %v514_v28 = vmul.f32 0.5, %v513_v41 }
  0xec   :  { %v1495_v32 = vadd.f32 %v474_v26, %v464_v40  ;;  %v727_v40 = vld [vmem:[#allocation9 + $0xd8] sm:$0xff] }
  0xed   :  { %v1497_v33 = vadd.f32 %v475_v0, %v465_v21  ;;  %v1499_v39 = vpop.eup %1124  ;;  %v515_v43 = vsub.f32 1.5, %v514_v28  ;;  %958 = vmatpush.msrb.mxu0 %v727_v40  ;;  %v763_v28 = vld [vmem:[#allocation9 + $0x1f8] sm:$0xff] }
  0xee   :  { %v522_v55 = vmul.f32 %v1499_v39, %v1442_v5  ;;  %vm494_vm5 = vcmp.gt.f32.partialorder %v1495_v32, 0.0  ;;  %v420_v56 = vpop.f32.mrf.mxu2  ;;  %v1511_v44 = vpop.eup %1126  ;;  %vm528_vm8 = vweird.f32 %v1499_v39  ;;  %988 = vmatpush.msrb.mxu1 %v763_v28 }
  0xef   :  { %vm495_vm6 = vcmp.gt.f32.partialorder %v1497_v33, 0.0  ;;  %v452_v57 = vpop.f32.mrf.mxu3  ;;  %v516_v7 = vmul.f32 %v1433_v3, %v515_v43  ;;  %v1517_v8 = vsel %vm494_vm5, %v1495_v32, 1.0  ;;  %v359_v47 = vpop.f32.mrf.mxu0  ;;  %v532_v51 = vmul.f32 %v1511_v44, %v1459_v16  ;;  %v725_v43 = vld [vmem:[#allocation9 + $0xc8] sm:$0xff]  ;;  %vm1583_vm12 = vmor %vm527_vm9, %vm528_vm8 }
  0xf0   :  { %v1522_v45 = vsel %vm495_vm6, %v1497_v33, 1.0  ;;  %v1524_v46 = vadd.f32 %v452_v57, %v420_v56  ;;  %v391_v14 = vpop.f32.mrf.mxu1  ;;  %v523_v50 = vmul.f32 %v1499_v39, %v522_v55  ;;  %1128 = vrsqrt.f32 %v1517_v8  ;;  %959 = vmatpush.msrb.mxu0 %v725_v43  ;;  %v757_v43 = vld [vmem:[#allocation9 + $0x1c8] sm:$0xff] }
  0xf1   :  { %v520_v58 = vsel %vm519_vm7, %v1433_v3, %v516_v7  ;;  %1130 = vrsqrt.f32 %v1522_v45  ;;  %v533_v6 = vmul.f32 %v1511_v44, %v532_v51  ;;  %v1558_v11 = vadd.f32 %v391_v14, %v359_v47  ;;  %v761_v51 = vld [vmem:[#allocation9 + $0x1e8] sm:$0xff] }
  0xf2   :  { %v611_v62 = vsel %vm491_vm0, %v520_v58, 0.0  ;;  %v524_v63 = vmul.f32 0.5, %v523_v50  ;;  %v476_v18 = vmul.f32 %v1524_v46, %v1524_v46  ;;  %v825_v50 = vld [vmem:[#allocation9 + $0x3e8] sm:$0xff]  ;;  %vm538_vm13 = vweird.f32 %v1511_v44  ;;  %989 = vmatpush.msrb.mxu1 %v761_v51  ;;  %v787_v58 = vld [vmem:[#allocation9 + $0x2b8] sm:$0xff]  ;;  %960 = vmatpush.msrb.mxu0 %v723_v12 }
  0xf3   :  { %v621_v3 = vmul.f32 %v611_v62, %v1395_v30  ;;  %v534_v21 = vmul.f32 0.5, %v533_v6  ;;  %v631_v25 = vmul.f32 %v611_v62, %v1387_v9  ;;  %v651_v26 = vmul.f32 %v611_v62, %v1389_v20  ;;  %1053 = vmatpush.msrb.mxu3 %v825_v50  ;;  %1024 = vmatpush.msrb.mxu2 %v787_v58  ;;  %vm1642_vm4 = vmor %vm537_vm10, %vm538_vm13  ;;  %v817_v16 = vld [vmem:[#allocation9 + $0x3a8] sm:$0xff] }
  0xf4   :  { %v525_v41 = vsub.f32 1.5, %v524_v63  ;;  %v1561_v24 = vadd.f32 %v476_v18, %v466_v1  ;;  %v477_v48 = vmul.f32 %v1558_v11, %v1558_v11  ;;  %vm547_vm14 = vweird.f32 %v1517_v8  ;;  %990 = vmatpush.msrb.mxu1 %v759_v38  ;;  %v753_v38 = vld [vmem:[#allocation9 + $0x1a8] sm:$0xff] }
  0xf5   :  { %v1566_v0 = vsub.f32 %v621_v3, %v1543_v59  ;;  %v535_v1 = vsub.f32 1.5, %v534_v21  ;;  %v641_v18 = vsel %vm491_vm0, %v631_v25, 1.0  ;;  %v823_v3 = vld [vmem:[#allocation9 + $0x3d8] sm:$0xff]  ;;  %v785_v21 = vld [vmem:[#allocation9 + $0x2a8] sm:$0xff]  ;;  %vm557_vm8 = vweird.f32 %v1522_v45 }
  0xf6   :  { %v1569_v54 = vpop.eup %1128  ;;  %v526_v55 = vmul.f32 %v1499_v39, %v525_v41  ;;  %vm496_vm11 = vcmp.gt.f32.partialorder %v1561_v24, 0.0  ;;  %v423_v9 = vpop.f32.mrf.mxu2  ;;  %1054 = vmatpush.msrb.mxu3 %v823_v3  ;;  %v1621_v28 = vadd.f32 %v477_v48, %v1485_v27  ;;  %991 = vmatpush.msrb.mxu1 %v757_v43  ;;  %v819_v48 = vld [vmem:[#allocation9 + $0x3b8] sm:$0xff] }
  0xf7   :  { %v455_v56 = vpop.f32.mrf.mxu3  ;;  %v1574_v20 = vpop.eup %1130  ;;  %v1577_v57 = vmul.f32 %v1566_v0, %v651_v26  ;;  %v542_v47 = vmul.f32 %v1569_v54, %v1517_v8  ;;  %v1592_v14 = vsel %vm496_vm11, %v1561_v24, 1.0  ;;  %v1612_v41 = vmul.f32 %v1511_v44, %v535_v1  ;;  %1025 = vmatpush.msrb.mxu2 %v785_v21 }
  0xf8   :  { %v530_v5 = vsel %vm1583_vm12, %v1499_v39, %v526_v55  ;;  %v552_v52 = vmul.f32 %v1574_v20, %v1522_v45  ;;  %1132 = vrsqrt.f32 %v1592_v14  ;;  %v362_v6 = vpop.f32.mrf.mxu0  ;;  %v394_v39 = vpop.f32.mrf.mxu1  ;;  %vm548_vm15 = vweird.f32 %v1569_v54  ;;  %v721_v55 = vld [vmem:[#allocation9 + $0xa8] sm:$0xff]  ;;  %1055 = vmatpush.msrb.mxu3 %v821_v35 }
  0xf9   :  { %v612_v62 = vsel %vm492_vm1, %v530_v5, 0.0  ;;  %v543_v63 = vmul.f32 %v1569_v54, %v542_v47  ;;  %908 = vmatmul.f32.vlgmr.msra.gmra.mxu2 %v1577_v57  ;;  %vm558_vm3 = vweird.f32 %v1574_v20  ;;  %v1627_v47 = vadd.f32 %v455_v56, %v423_v9  ;;  %v755_v5 = vld [vmem:[#allocation9 + $0x1b8] sm:$0xff]  ;;  %961 = vmatpush.msrb.mxu0 %v721_v55  ;;  %vm1668_vm7 = vmor %vm547_vm14, %vm548_vm15  ;;  %v717_v35 = vld [vmem:[#allocation9 + $0x88] sm:$0xff] }
  0xfa   :  { %v622_v40 = vmul.f32 %v612_v62, %v1424_v60  ;;  %v1617_v26 = vmul.f32 %v612_v62, %v1399_v34  ;;  %v553_v25 = vmul.f32 %v1574_v20, %v552_v52  ;;  %v652_v1 = vmul.f32 %v612_v62, %v1411_v13  ;;  %v783_v13 = vld [vmem:[#allocation9 + $0x298] sm:$0xff]  ;;  %1056 = vmatpush.msrb.mxu3 %v819_v48  ;;  %vm1692_vm9 = vmor %vm557_vm8, %vm558_vm3  ;;  %v813_v45 = vld [vmem:[#allocation9 + $0x388] sm:$0xff] }
  0xfb   :  { %v544_v30 = vmul.f32 0.5, %v543_v63  ;;  %v1629_v34 = vadd.f32 %v394_v39, %v362_v6  ;;  %vm497_vm0 = vcmp.gt.f32.partialorder %v1621_v28, 0.0  ;;  %v1633_v27 = vmul.f32 %v1566_v0, %v641_v18  ;;  %v719_v63 = vld [vmem:[#allocation9 + $0x98] sm:$0xff]  ;;  %992 = vmatpush.msrb.mxu1 %v755_v5  ;;  %1026 = vmatpush.msrb.mxu2 %v783_v13 }
  0xfc   :  { %v1625_v7 = vsub.f32 %v622_v40, %v1556_v23  ;;  %v554_v51 = vmul.f32 0.5, %v553_v25  ;;  %v1649_v0 = vsel %vm497_vm0, %v1621_v28, 1.0  ;;  %v478_v56 = vmul.f32 %v1627_v47, %v1627_v47  ;;  %v781_v40 = vld [vmem:[#allocation9 + $0x288] sm:$0xff]  ;;  %v815_v25 = vld [vmem:[#allocation9 + $0x398] sm:$0xff]  ;;  %1057 = vmatpush.msrb.mxu3 %v817_v16  ;;  %962 = vmatpush.msrb.mxu0 %v719_v63 }
  0xfd   :  { %v545_v50 = vsub.f32 1.5, %v544_v30  ;;  %v479_v58 = vmul.f32 %v1629_v34, %v1629_v34  ;;  %v540_v39 = vsel %vm1642_vm4, %v1511_v44, %v1612_v41  ;;  %1134 = vrsqrt.f32 %v1649_v0  ;;  %844 = vmatmul.f32.vlgmr.msra.gmra.mxu0 %v1633_v27  ;;  %993 = vmatpush.msrb.mxu1 %v753_v38  ;;  %v747_v38 = vld [vmem:[#allocation9 + $0x178] sm:$0xff] }
  0xfe   :  { %v1636_v52 = vmul.f32 %v1625_v7, %v652_v1  ;;  %v426_v12 = vpop.f32.mrf.mxu2  ;;  %v1655_v6 = vpop.eup %1132  ;;  %v555_v3 = vsub.f32 1.5, %v554_v51  ;;  %v1675_v41 = vadd.f32 %v478_v56, %v1528_v49  ;;  %v751_v49 = vld [vmem:[#allocation9 + $0x198] sm:$0xff]  ;;  %v613_v1 = vsel %vm493_vm2, %v540_v39, 0.0  ;;  %1027 = vmatpush.msrb.mxu2 %v781_v40  ;;  %1058 = vmatpush.msrb.mxu3 %v815_v25  ;;  %v749_v56 = vld [vmem:[#allocation9 + $0x188] sm:$0xff] }
  0xff   :  { %v458_v62 = vpop.f32.mrf.mxu3  ;;  %v546_v18 = vmul.f32 %v1569_v54, %v545_v50  ;;  %v562_v44 = vmul.f32 %v1655_v6, %v1592_v14  ;;  %v1678_v30 = vadd.f32 %v479_v58, %v1540_v53  ;;  %v779_v53 = vld [vmem:[#allocation9 + $0x278] sm:$0xff]  ;;  %v642_v9 = vsel %vm492_vm1, %v1617_v26, 1.0  ;;  %963 = vmatpush.msrb.mxu0 %v717_v35  ;;  %v777_v58 = vld [vmem:[#allocation9 + $0x268] sm:$0xff]  ;;  %994 = vmatpush.msrb.mxu1 %v751_v49 }
 0x100   :  { %940 = vmatmul.f32.vlgmr.msra.gmra.mxu3 %v1636_v52  ;;  %v556_v43 = vmul.f32 %v1574_v20, %v555_v3  ;;  %v1686_v55 = vadd.f32 %v458_v62, %v426_v12  ;;  %vm498_vm10 = vcmp.gt.f32.partialorder %v1675_v41, 0.0  ;;  %v715_v51 = vld [vmem:[#allocation9 + $0x78] sm:$0xff]  ;;  %vm567_vm13 = vweird.f32 %v1592_v14  ;;  %1028 = vmatpush.msrb.mxu2 %v779_v53  ;;  %v713_v3 = vld [vmem:[#allocation9 + $0x68] sm:$0xff] }
 0x101   :  { %v550_v8 = vsel %vm1668_vm7, %v1569_v54, %v546_v18  ;;  %v563_v54 = vmul.f32 %v1655_v6, %v562_v44  ;;  %vm499_vm12 = vcmp.gt.f32.partialorder %v1678_v30, 0.0  ;;  %v1705_v5 = vsel %vm498_vm10, %v1675_v41, 1.0  ;;  %v811_v62 = vld [vmem:[#allocation9 + $0x378] sm:$0xff]  ;;  %1059 = vmatpush.msrb.mxu3 %v813_v45  ;;  %964 = vmatpush.msrb.mxu0 %v715_v51  ;;  %v745_v50 = vld [vmem:[#allocation9 + $0x168] sm:$0xff] }
 0x102   :  { %v560_v48 = vsel %vm1692_vm9, %v1574_v20, %v556_v43  ;;  %v1710_v13 = vsel %vm499_vm12, %v1678_v30, 1.0  ;;  %v614_v20 = vsel %vm494_vm5, %v550_v8, 0.0  ;;  %1136 = vrsqrt.f32 %v1705_v5  ;;  %995 = vmatpush.msrb.mxu1 %v749_v56  ;;  %1029 = vmatpush.msrb.mxu2 %v777_v58  ;;  %v775_v35 = vld [vmem:[#allocation9 + $0x258] sm:$0xff]  ;;  %v809_v8 = vld [vmem:[#allocation9 + $0x368] sm:$0xff] }
 0x103   :  { %v564_v12 = vmul.f32 0.5, %v563_v54  ;;  %v1719_v16 = vpop.eup %1134  ;;  %v1722_v60 = vmul.f32 %v613_v1, %v1414_v15  ;;  %vm568_vm1 = vweird.f32 %v1655_v6  ;;  %1138 = vrsqrt.f32 %v1710_v13  ;;  %1060 = vmatpush.msrb.mxu3 %v811_v62  ;;  %v711_v53 = vld [vmem:[#allocation9 + $0x58] sm:$0xff]  ;;  %965 = vmatpush.msrb.mxu0 %v713_v3  ;;  %v773_v54 = vld [vmem:[#allocation9 + $0x248] sm:$0xff] }
 0x104   :  { %v480_v26 = vmul.f32 %v1686_v55, %v1686_v55  ;;  %v1730_v63 = vsel %vm495_vm6, %v560_v48, 0.0  ;;  %v572_v18 = vmul.f32 %v1719_v16, %v1649_v0  ;;  %vm577_vm14 = vweird.f32 %v1649_v0  ;;  %vm1757_vm15 = vmor %vm567_vm13, %vm568_vm1  ;;  %996 = vmatpush.msrb.mxu1 %v747_v38  ;;  %1030 = vmatpush.msrb.mxu2 %v775_v35  ;;  %v743_v56 = vld [vmem:[#allocation9 + $0x158] sm:$0xff] }
 0x105   :  { %v565_v39 = vsub.f32 1.5, %v564_v12  ;;  %v1736_v15 = vmul.f32 %v1625_v7, %v642_v9  ;;  %v623_v21 = vmul.f32 %v613_v1, %v1426_v61  ;;  %v633_v44 = vmul.f32 %v613_v1, %v1403_v36  ;;  %1061 = vmatpush.msrb.mxu3 %v809_v8  ;;  %v709_v9 = vld [vmem:[#allocation9 + $0x48] sm:$0xff]  ;;  %966 = vmatpush.msrb.mxu0 %v711_v53  ;;  %v771_v62 = vld [vmem:[#allocation9 + $0x238] sm:$0xff] }
 0x106   :  { %v1739_v40 = vadd.f32 %v480_v26, %v1553_v22  ;;  %v624_v25 = vmul.f32 %v614_v20, %v1495_v32  ;;  %v654_v43 = vmul.f32 %v614_v20, %v1461_v17  ;;  %v573_v49 = vmul.f32 %v1719_v16, %v572_v18  ;;  %997 = vmatpush.msrb.mxu1 %v745_v50  ;;  %v707_v8 = vld [vmem:[#allocation9 + $0x38] sm:$0xff]  ;;  %v769_v50 = vld [vmem:[#allocation9 + $0x228] sm:$0xff] }
 0x107   :  { %v566_v7 = vmul.f32 %v1655_v6, %v565_v39  ;;  %876 = vmatmul.f32.vlgmr.msra.gmra.mxu1 %v1736_v15  ;;  %v634_v22 = vmul.f32 %v614_v20, %v1430_v2  ;;  %v1751_v36 = vmul.f32 %v1730_v63, %v1463_v37  ;;  %v643_v1 = vsel %vm493_vm2, %v633_v44, 1.0  ;;  %v807_v37 = vld [vmem:[#allocation9 + $0x358] sm:$0xff]  ;;  %1031 = vmatpush.msrb.mxu2 %v773_v54  ;;  %v741_v17 = vld [vmem:[#allocation9 + $0x148] sm:$0xff] }
 0x108   :  { %vm500_vm3 = vcmp.gt.f32.partialorder %v1739_v40, 0.0  ;;  %v672_v2 = vsub.f32 %v623_v21, %v1543_v59  ;;  %v1765_v45 = vpop.eup %1136  ;;  %v574_v51 = vmul.f32 0.5, %v573_v49  ;;  %v673_v61 = vsub.f32 %v624_v25, %v1556_v23  ;;  %1062 = vmatpush.msrb.mxu3 %v807_v37  ;;  %967 = vmatpush.msrb.mxu0 %v709_v9 }
 0x109   :  { %v570_v14 = vsel %vm1757_vm15, %v1655_v6, %v566_v7  ;;  %v1773_v48 = vsel %vm500_vm3, %v1739_v40, 1.0  ;;  %v1776_v58 = vpop.eup %1138  ;;  %v582_v20 = vmul.f32 %v1765_v45, %v1705_v5  ;;  %vm587_vm2 = vweird.f32 %v1705_v5  ;;  %998 = vmatpush.msrb.mxu1 %v743_v56  ;;  %1032 = vmatpush.msrb.mxu2 %v771_v62  ;;  %v805_v7 = vld [vmem:[#allocation9 + $0x348] sm:$0xff] }
 0x10a   :  { %1140 = vrsqrt.f32 %v1773_v48  ;;  %v644_v6 = vsel %vm494_vm5, %v634_v22, 1.0  ;;  %v625_v12 = vmul.f32 %v1730_v63, %v1497_v33  ;;  %v616_v26 = vsel %vm496_vm11, %v570_v14, 0.0  ;;  %968 = vmatpush.msrb.mxu0 %v707_v8  ;;  %1063 = vmatpush.msrb.mxu3 %v805_v7 }
 0x10b   :  { %v575_v39 = vsub.f32 1.5, %v574_v51  ;;  %vm578_vm4 = vweird.f32 %v1719_v16  ;;  %v592_v18 = vmul.f32 %v1776_v58, %v1710_v13  ;;  %v583_v32 = vmul.f32 %v1765_v45, %v582_v20  ;;  %1033 = vmatpush.msrb.mxu2 %v769_v50  ;;  %999 = vmatpush.msrb.mxu1 %v741_v17  ;;  %v739_v20 = vld [vmem:[#allocation9 + $0x138] sm:$0xff] }
 0x10c   :  { %vm597_vm5 = vweird.f32 %v1710_v13  ;;  %v1793_v3 = vmul.f32 %v672_v2, %v643_v1  ;;  %v1796_v38 = vmul.f32 %v672_v2, %v1722_v60  ;;  %v1800_v25 = vmul.f32 %v673_v61, %v644_v6  ;;  %vm1808_vm7 = vmor %vm577_vm14, %vm578_vm4  ;;  %v701_v60 = vld [vmem:[#allocation9 + $0x8] sm:$0xff] }
 0x10d   :  { %v576_v21 = vmul.f32 %v1719_v16, %v575_v39  ;;  %v593_v44 = vmul.f32 %v1776_v58, %v592_v18  ;;  %v1802_v35 = vmul.f32 %v673_v61, %v654_v43  ;;  %v584_v49 = vmul.f32 0.5, %v583_v32  ;;  %v767_v61 = vld [vmem:[#allocation9 + $0x218] sm:$0xff]  ;;  %v801_v39 = vld [vmem:[#allocation9 + $0x328] sm:$0xff]  ;;  %1000 = vmatpush.msrb.mxu1 %v739_v20 }
 0x10e   :  { %847 = vmatmul.f32.gmra.mxu0 %v1793_v3  ;;  %911 = vmatmul.f32.gmra.mxu2 %v1796_v38  ;;  %v635_v43 = vmul.f32 %v1730_v63, %v1437_v4  ;;  %v674_v22 = vsub.f32 %v625_v12, %v1543_v59  ;;  %v626_v53 = vmul.f32 %v616_v26, %v1561_v24  ;;  %vm588_vm8 = vweird.f32 %v1765_v45  ;;  %v705_v4 = vld [vmem:[#allocation9 + $0x28] sm:$0xff]  ;;  %v803_v63 = vld [vmem:[#allocation9 + $0x338] sm:$0xff] }
 0x10f   :  { %v580_v0 = vsel %vm1808_vm7, %v1719_v16, %v576_v21  ;;  %v594_v1 = vmul.f32 0.5, %v593_v44  ;;  %879 = vmatmul.f32.gmra.mxu1 %v1800_v25  ;;  %943 = vmatmul.f32.gmra.mxu3 %v1802_v35  ;;  %v636_v2 = vmul.f32 %v616_v26, %v1447_v19  ;;  %v656_v37 = vmul.f32 %v616_v26, %v1524_v46  ;;  %v703_v46 = vld [vmem:[#allocation9 + $0x18] sm:$0xff]  ;;  %v765_v26 = vld [vmem:[#allocation9 + $0x208] sm:$0xff] }
 0x110   :  { %v1825_v54 = vpop.eup %1140  ;;  %v617_v14 = vsel %vm497_vm0, %v580_v0, 0.0  ;;  %v585_v51 = vsub.f32 1.5, %v584_v49  ;;  %v645_v16 = vsel %vm495_vm6, %v635_v43, 1.0  ;;  %vm598_vm9 = vweird.f32 %v1776_v58  ;;  %969 = vmatpush.msrb.mxu0 %v705_v4  ;;  %1064 = vmatpush.msrb.mxu3 %v803_v63  ;;  %vm589_vm6 = vmor %vm587_vm2, %vm588_vm8  ;;  %v737_v43 = vld [vmem:[#allocation9 + $0x128] sm:$0xff] }
 0x111   :  { %v595_v9 = vsub.f32 1.5, %v594_v1  ;;  %v602_v19 = vmul.f32 %v1825_v54, %v1773_v48  ;;  %v1836_v56 = vmul.f32 %v674_v22, %v1751_v36  ;;  %v1839_v33 = vmul.f32 %v674_v22, %v645_v16  ;;  %1034 = vmatpush.msrb.mxu2 %v767_v61  ;;  %v799_v22 = vld [vmem:[#allocation9 + $0x318] sm:$0xff]  ;;  %v797_v4 = vld [vmem:[#allocation9 + $0x308] sm:$0xff]  ;;  %1001 = vmatpush.msrb.mxu1 %v737_v43 }
 0x112   :  { %v586_v6 = vmul.f32 %v1765_v45, %v585_v51  ;;  %v646_v12 = vsel %vm496_vm11, %v636_v2, 1.0  ;;  %v675_v62 = vsub.f32 %v626_v53, %v1556_v23  ;;  %v627_v32 = vmul.f32 %v617_v14, %v1621_v28  ;;  %vm1857_vm11 = vmor %vm597_vm5, %vm598_vm9  ;;  %970 = vmatpush.msrb.mxu0 %v703_v46  ;;  %1065 = vmatpush.msrb.mxu3 %v801_v39  ;;  %v735_v2 = vld [vmem:[#allocation9 + $0x118] sm:$0xff]  ;;  %v733_v16 = vld [vmem:[#allocation9 + $0x108] sm:$0xff] }
 0x113   :  { %v596_v36 = vmul.f32 %v1776_v58, %v595_v9  ;;  %v603_v18 = vmul.f32 %v1825_v54, %v602_v19  ;;  %v637_v24 = vmul.f32 %v617_v14, %v1451_v10  ;;  %1035 = vmatpush.msrb.mxu2 %v765_v26  ;;  %vm608_vm13 = vweird.f32 %v1825_v54  ;;  %1002 = vmatpush.msrb.mxu1 %v735_v2 }
 0x114   :  { %v590_v21 = vsel %vm589_vm6, %v1765_v45, %v586_v6  ;;  %v1861_v5 = vmul.f32 %v675_v62, %v646_v12  ;;  %v1863_v8 = vmul.f32 %v675_v62, %v656_v37  ;;  %v676_v13 = vsub.f32 %v627_v32, %v1543_v59  ;;  %971 = vmatpush.msrb.mxu0 %v701_v60 }
 0x115   :  { %v618_v10 = vsel %vm498_vm10, %v590_v21, 0.0  ;;  %v600_v45 = vsel %vm1857_vm11, %v1776_v58, %v596_v36  ;;  %v604_v7 = vmul.f32 0.5, %v603_v18  ;;  %v647_v50 = vsel %vm497_vm0, %v637_v24, 1.0  ;;  %1066 = vmatpush.msrb.mxu3 %v799_v22  ;;  %1003 = vmatpush.msrb.mxu1 %v733_v16 }
 0x116   :  { %850 = vmatmul.f32.gmra.mxu0 %v1839_v33  ;;  %914 = vmatmul.f32.gmra.mxu2 %v1836_v56  ;;  %v628_v49 = vmul.f32 %v618_v10, %v1675_v41  ;;  %v619_v53 = vsel %vm499_vm12, %v600_v45, 0.0  ;;  %v638_v17 = vmul.f32 %v618_v10, %v1489_v29  ;;  %v657_v0 = vmul.f32 %v617_v14, %v1558_v11 }
 0x117   :  { %v605_v58 = vsub.f32 1.5, %v604_v7  ;;  %882 = vmatmul.f32.gmra.mxu1 %v1861_v5  ;;  %946 = vmatmul.f32.gmra.mxu3 %v1863_v8  ;;  %v658_v63 = vmul.f32 %v618_v10, %v1627_v47  ;;  %vm607_vm1 = vweird.f32 %v1773_v48  ;;  %v686_v29 = vmul.f32 %v676_v13, %v647_v50 }
 0x118   :  { %v677_v1 = vsub.f32 %v628_v49, %v1556_v23  ;;  %v648_v51 = vsel %vm498_vm10, %v638_v17, 1.0  ;;  %vm609_vm0 = vmor %vm607_vm1, %vm608_vm13  ;;  %v696_v11 = vmul.f32 %v676_v13, %v657_v0  ;;  %v629_v28 = vmul.f32 %v619_v53, %v1678_v30  ;;  %1067 = vmatpush.msrb.mxu3 %v797_v4 }
 0x119   :  { %v606_v37 = vmul.f32 %v1825_v54, %v605_v58  ;;  %v639_v14 = vmul.f32 %v619_v53, %v1493_v31  ;;  %v659_v20 = vmul.f32 %v619_v53, %v1629_v34 }
 0x11a   :  { %v687_v61 = vmul.f32 %v677_v1, %v648_v51  ;;  %v697_v9 = vmul.f32 %v677_v1, %v658_v63  ;;  %v678_v46 = vsub.f32 %v629_v28, %v1543_v59 }
 0x11b   :  { %v610_v47 = vsel %vm609_vm0, %v1825_v54, %v606_v37  ;;  %v649_v31 = vsel %vm499_vm12, %v639_v14, 1.0 }
 0x11c   :  { %v620_v41 = vsel %vm500_vm3, %v610_v47, 0.0  ;;  %v698_v62 = vmul.f32 %v678_v46, %v659_v20 }
 0x11d   :  { %v630_v48 = vmul.f32 %v620_v41, %v1739_v40  ;;  %v640_v19 = vmul.f32 %v620_v41, %v1503_v42  ;;  %v660_v12 = vmul.f32 %v620_v41, %v1686_v55  ;;  %v688_v42 = vmul.f32 %v678_v46, %v649_v31 }
 0x11e   :  { %853 = vmatmul.f32.gmra.mxu0 %v686_v29  ;;  %917 = vmatmul.f32.gmra.mxu2 %v696_v11 }
 0x11f   :  { %885 = vmatmul.f32.gmra.mxu1 %v687_v61  ;;  %949 = vmatmul.f32.gmra.mxu3 %v697_v9  ;;  %v679_v54 = vsub.f32 %v630_v48, %v1556_v23  ;;  %v650_v6 = vsel %vm500_vm3, %v640_v19, 1.0 }
 0x121   :  { %v689_v26 = vmul.f32 %v679_v54, %v650_v6  ;;  %v699_v39 = vmul.f32 %v679_v54, %v660_v12 }
 0x126   :  { %856 = vmatmul.f32.gmra.mxu0 %v688_v42  ;;  %920 = vmatmul.f32.gmra.mxu2 %v698_v62 }
 0x127   :  { %888 = vmatmul.f32.gmra.mxu1 %v689_v26  ;;  %952 = vmatmul.f32.gmra.mxu3 %v699_v39 }
 0x12e   :  { %972 = vmatmul.f32.vlgmr.msrb.gmra.mxu0 %v1633_v27  ;;  %1036 = vmatmul.f32.vlgmr.msrb.gmra.mxu2 %v1577_v57 }
 0x12f   :  { %1004 = vmatmul.f32.vlgmr.msrb.gmra.mxu1 %v1736_v15  ;;  %1068 = vmatmul.f32.vlgmr.msrb.gmra.mxu3 %v1636_v52 }
 0x136   :  { %975 = vmatmul.f32.gmra.mxu0 %v1793_v3  ;;  %1039 = vmatmul.f32.gmra.mxu2 %v1796_v38 }
 0x137   :  { %1007 = vmatmul.f32.gmra.mxu1 %v1800_v25  ;;  %1071 = vmatmul.f32.gmra.mxu3 %v1802_v35 }
 0x13e   :  { %978 = vmatmul.f32.gmra.mxu0 %v1839_v33  ;;  %1042 = vmatmul.f32.gmra.mxu2 %v1836_v56 }
 0x13f   :  { %1010 = vmatmul.f32.gmra.mxu1 %v1861_v5  ;;  %1074 = vmatmul.f32.gmra.mxu3 %v1863_v8 }
 0x146   :  { %981 = vmatmul.f32.gmra.mxu0 %v686_v29  ;;  %1045 = vmatmul.f32.gmra.mxu2 %v696_v11 }
 0x147   :  { %1013 = vmatmul.f32.gmra.mxu1 %v687_v61  ;;  %1077 = vmatmul.f32.gmra.mxu3 %v697_v9 }
 0x14e   :  { %984 = vmatmul.f32.gmra.mxu0 %v688_v42  ;;  %1048 = vmatmul.f32.gmra.mxu2 %v698_v62 }
 0x14f   :  { %1016 = vmatmul.f32.gmra.mxu1 %v689_v26  ;;  %1080 = vmatmul.f32.gmra.mxu3 %v699_v39 }
 0x17a   :  { %v845_v59 = vpop.f32.mrf.mxu0 }
 0x17c   :  { %v909_v34 = vpop.f32.mrf.mxu2 }
 0x183   :  { %v941_v27 = vpop.f32.mrf.mxu3 }
 0x184   :  { %v877_v23 = vpop.f32.mrf.mxu1 }
 0x185   :  { %v878_v57 = vadd.f32 %v877_v23, %v845_v59 }
 0x187   :  { %v910_v52 = vadd.f32 %v909_v34, %v878_v57 }
 0x189   :  { %v942_v30 = vadd.f32 %v941_v27, %v910_v52 }
 0x18b   :  { %v848_v55 = vpop.f32.mrf.mxu0  ;;  %1084 = vst [vmem:[#allocation10] sm:$0xff] %v942_v30 }
 0x18c   :  { %v880_v15 = vpop.f32.mrf.mxu1 }
 0x18d   :  { %v881_v40 = vadd.f32 %v880_v15, %v848_v55 }
 0x191   :  { %v912_v3 = vpop.f32.mrf.mxu2 }
 0x192   :  { %v913_v38 = vadd.f32 %v912_v3, %v881_v40  ;;  %v944_v25 = vpop.f32.mrf.mxu3 }
 0x193   :  { %v851_v35 = vpop.f32.mrf.mxu0 }
 0x194   :  { %v945_v56 = vadd.f32 %v944_v25, %v913_v38  ;;  %v883_v33 = vpop.f32.mrf.mxu1 }
 0x195   :  { %v884_v36 = vadd.f32 %v883_v33, %v851_v35 }
 0x196   :  { %1086 = vst [vmem:[#allocation10 + $0x10] sm:$0xff] %v945_v56 }
 0x199   :  { %v915_v18 = vpop.f32.mrf.mxu2 }
 0x19a   :  { %v916_v32 = vadd.f32 %v915_v18, %v884_v36  ;;  %v947_v24 = vpop.f32.mrf.mxu3 }
 0x19b   :  { %v854_v21 = vpop.f32.mrf.mxu0 }
 0x19c   :  { %v948_v44 = vadd.f32 %v947_v24, %v916_v32  ;;  %v886_v5 = vpop.f32.mrf.mxu1 }
 0x19d   :  { %v887_v8 = vadd.f32 %v886_v5, %v854_v21 }
 0x19e   :  { %1088 = vst [vmem:[#allocation10 + $0x20] sm:$0xff] %v948_v44 }
 0x1a1   :  { %v918_v10 = vpop.f32.mrf.mxu2 }
 0x1a2   :  { %v919_v45 = vadd.f32 %v918_v10, %v887_v8  ;;  %v950_v7 = vpop.f32.mrf.mxu3 }
 0x1a3   :  { %v857_v60 = vpop.f32.mrf.mxu0 }
 0x1a4   :  { %v951_v13 = vadd.f32 %v950_v7, %v919_v45  ;;  %v889_v49 = vpop.f32.mrf.mxu1 }
 0x1a5   :  { %v890_v43 = vadd.f32 %v889_v49, %v857_v60 }
 0x1a6   :  { %1090 = vst [vmem:[#allocation10 + $0x30] sm:$0xff] %v951_v13 }
 0x1a9   :  { %v921_v22 = vpop.f32.mrf.mxu2 }
 0x1aa   :  { %v922_v53 = vadd.f32 %v921_v22, %v890_v43  ;;  %v953_v58 = vpop.f32.mrf.mxu3 }
 0x1ab   :  { %v973_v50 = vpop.f32.mrf.mxu0 }
 0x1ac   :  { %v954_v17 = vadd.f32 %v953_v58, %v922_v53  ;;  %v1005_v0 = vpop.f32.mrf.mxu1 }
 0x1ad   :  { %v1006_v1 = vadd.f32 %v1005_v0, %v973_v50 }
 0x1ae   :  { %1092 = vst [vmem:[#allocation10 + $0x40] sm:$0xff] %v954_v17 }
 0x1b1   :  { %v1037_v2 = vpop.f32.mrf.mxu2 }
 0x1b2   :  { %v1038_v4 = vadd.f32 %v1037_v2, %v1006_v1  ;;  %v1069_v63 = vpop.f32.mrf.mxu3 }
 0x1b3   :  { %v976_v37 = vpop.f32.mrf.mxu0 }
 0x1b4   :  { %v1070_v51 = vadd.f32 %v1069_v63, %v1038_v4  ;;  %v1008_v29 = vpop.f32.mrf.mxu1 }
 0x1b5   :  { %v1009_v11 = vadd.f32 %v1008_v29, %v976_v37 }
 0x1b6   :  { %1085 = vst [vmem:[#allocation10 + $0x8] sm:$0xff] %v1070_v51 }
 0x1b9   :  { %v1040_v28 = vpop.f32.mrf.mxu2 }
 0x1ba   :  { %v1041_v14 = vadd.f32 %v1040_v28, %v1009_v11  ;;  %v1072_v16 = vpop.f32.mrf.mxu3 }
 0x1bb   :  { %v979_v47 = vpop.f32.mrf.mxu0 }
 0x1bc   :  { %v1073_v61 = vadd.f32 %v1072_v16, %v1041_v14  ;;  %v1011_v9 = vpop.f32.mrf.mxu1 }
 0x1bd   :  { %v1012_v41 = vadd.f32 %v1011_v9, %v979_v47 }
 0x1be   :  { %1087 = vst [vmem:[#allocation10 + $0x18] sm:$0xff] %v1073_v61 }
 0x1c1   :  { %v1043_v48 = vpop.f32.mrf.mxu2 }
 0x1c2   :  { %v1044_v19 = vadd.f32 %v1043_v48, %v1012_v41  ;;  %v1075_v46 = vpop.f32.mrf.mxu3 }
 0x1c3   :  { %v982_v31 = vpop.f32.mrf.mxu0 }
 0x1c4   :  { %v1076_v54 = vadd.f32 %v1075_v46, %v1044_v19  ;;  %v1014_v20 = vpop.f32.mrf.mxu1 }
 0x1c5   :  { %v1015_v6 = vadd.f32 %v1014_v20, %v982_v31 }
 0x1c6   :  { %1089 = vst [vmem:[#allocation10 + $0x28] sm:$0xff] %v1076_v54 }
 0x1c9   :  { %v1046_v12 = vpop.f32.mrf.mxu2 }
 0x1ca   :  { %v1047_v42 = vadd.f32 %v1046_v12, %v1015_v6  ;;  %v1078_v62 = vpop.f32.mrf.mxu3 }
 0x1cb   :  { %v985_v59 = vpop.f32.mrf.mxu0 }
 0x1cc   :  { %v1079_v26 = vadd.f32 %v1078_v62, %v1047_v42  ;;  %v1017_v39 = vpop.f32.mrf.mxu1 }
 0x1cd   :  { %v1018_v23 = vadd.f32 %v1017_v39, %v985_v59 }
 0x1ce   :  { %1091 = vst [vmem:[#allocation10 + $0x38] sm:$0xff] %v1079_v26 }
 0x1d1   :  { %v1049_v57 = vpop.f32.mrf.mxu2 }
 0x1d2   :  { %v1050_v34 = vadd.f32 %v1049_v57, %v1018_v23  ;;  %v1081_v27 = vpop.f32.mrf.mxu3 }
 0x1d4   :  { %v1082_v52 = vadd.f32 %v1081_v27, %v1050_v34 }
 0x1d6   :  { %1093 = vst [vmem:[#allocation10 + $0x48] sm:$0xff] %v1082_v52 }
 0x1d7   :  { %1106 = dma.vmem_to_hbm [thread:$0]  %s1099_s4, 1280, %s1101_s15, [#allocation6], %s1248_s30, %s1248_s30, %s1249_s6  }
 0x1d8   :  { %1242 = dma.done.wait [#allocation6], 1280  }
 0x1d9   :  { %1243 = vsyncadd [#allocation6], 4294966016 }
 0x1da   :  { %1111 = vsyncpa [#allocation5], 1 }
 0x1db   :  { %1112 = vsyncpa [#allocation8], 1 }
 0x1dc   :  { %1113 = vsyncpa [#allocation6], 1 }

</bundles_post_ra>
